<compile_context>
chip_gen: v7x
topology: tpu7x:2x2x1
jax: 0.10.0
libtpu: 0.0.40
codegen_flags: <defaults>
</compile_context>

<pallas_src>
import functools
import math

import jax
import jax.numpy as jnp
from jax.experimental import pallas as pl
from jax.experimental.pallas import tpu as pltpu

_MASK = -1e30  # large negative finite (safer than -inf for exp/max on TPU)


# ---------------------------------------------------------------------------
# Shared math helpers (used identically in kernel and reference)
# ---------------------------------------------------------------------------
def _gelu_tanh(u):
    return 0.5 * u * (1.0 + jnp.tanh(0.7978845608028654 * (u + 0.044715 * u * u * u)))


def _sigmoid(u):
    return 1.0 / (1.0 + jnp.exp(-u))


def _round_up(a, b):
    return ((a + b - 1) // b) * b


def _topk_mask(vals, k):
    """Boolean mask of the top-k entries per row (ties -> lowest index, exact)."""
    m, c = vals.shape
    colf = jax.lax.broadcasted_iota(jnp.int32, (m, c), 1).astype(jnp.float32)
    keep = None
    work = vals
    for _ in range(min(k, c)):
        mx = jnp.max(work, axis=-1, keepdims=True)
        is_max = work == mx
        first = jnp.min(jnp.where(is_max, colf, float(c)), axis=-1, keepdims=True)
        sel = colf == first
        keep = sel if keep is None else jnp.logical_or(keep, sel)
        work = jnp.where(sel, _MASK, work)
    return keep


def _default_block_m():
    # Bigger token tiles on 128 MiB-VMEM parts (v5e/v6e), smaller on v7x (64 MiB).
    try:
        info = pltpu.get_tpu_info()
        vmem = getattr(info, "vmem_capacity_bytes", 128 << 20)
        return 256 if vmem <= (64 << 20) else 512
    except Exception:
        return 256


# ---------------------------------------------------------------------------
# Fused gating kernel (one token tile per grid step)
# ---------------------------------------------------------------------------
def _gating_kernel(x_ref, w_ref, b_ref, prio_ref, m_ref, wc2_ref, bc2_ref, out_ref, *,
                   num_groups, experts_per_group, num_experts, nep, hqp,
                   top_k, top_groups, use_confidence):
    f32 = jnp.float32
    G = num_groups
    e_pg = experts_per_group
    ne = num_experts
    x = x_ref[...]                               # (TM, H), matmul dtype (f32 or bf16)
    tm = x.shape[0]

    # ---- ONE fused projection for all routers + conf layer-1 (MXU) ---------
    # column layout: [ experts (nep, lane-padded) | conf hidden (hqp) | groups (G) ]
    z = jnp.dot(x, w_ref[...], preferred_element_type=f32) + b_ref[...].astype(f32)
    el = z[:, :nep] * prio_ref[...].astype(f32)          # expert logits * priority
    gl = z[:, nep + hqp:nep + hqp + G]                   # group logits

    # ---- confidence estimator: layer-2 as a matmul (MXU has slack) ---------
    conf = None
    if use_confidence:
        h = _gelu_tanh(z[:, nep:nep + hqp])
        c = jnp.dot(h, wc2_ref[...].astype(f32), preferred_element_type=f32)
        conf = _sigmoid(c + bc2_ref[...].astype(f32))    # (TM, 1)

    # ---- group softmax + top-`top_groups` group gate ------------------------
    ge = jnp.exp(gl - jnp.max(gl, axis=-1, keepdims=True))
    gp = ge * pl.reciprocal(jnp.sum(ge, axis=-1, keepdims=True))
    gate = jnp.where(_topk_mask(gp, top_groups), gp, 0.0)            # (TM, G)

    # ---- per-group expert softmax, vectorized across groups -----------------
    ecol = jax.lax.broadcasted_iota(jnp.int32, (tm, nep), 1)
    elm = jnp.where(ecol < ne, el, _MASK)                # mask lane padding
    pe = jnp.exp(elm - jnp.max(elm, axis=-1, keepdims=True))          # 0 on padding
    in_g = [jnp.logical_and(ecol >= g * e_pg, ecol < (g + 1) * e_pg) for g in range(G)]
    # per-group sums via one-hot membership matmul (MXU) instead of G XLU reductions
    denom_g = jnp.dot(pe, m_ref[...].astype(f32), preferred_element_type=f32)  # (TM, G)
    denom = None
    for g in range(G):                                   # broadcast group denoms back
        dg = jnp.where(in_g[g], denom_g[:, g:g + 1], 0.0)
        denom = dg if denom is None else denom + dg
    probs = pe * pl.reciprocal(denom + 1e-30)

    # ---- confidence blend (hoisted: once over full expert width) ------------
    if use_confidence:
        probs = probs * conf + (1.0 - conf) * (1.0 / e_pg)

    # ---- per-group top-k keep mask + group gate per expert ------------------
    k_in = min(top_k, e_pg)
    keep = None
    gate_pe = None
    for g in range(G):
        kg = _topk_mask(jnp.where(in_g[g], probs, _MASK), k_in)
        keep = kg if keep is None else jnp.logical_or(keep, kg)
        gg = jnp.where(in_g[g], gate[:, g:g + 1], 0.0)   # static lane slice, no XLU sum
        gate_pe = gg if gate_pe is None else gate_pe + gg

    # ---- normalize + global top-k dispatch ----------------------------------
    scores = jnp.where(keep, probs, 0.0) * gate_pe
    scores = scores * pl.reciprocal(jnp.sum(scores, axis=-1, keepdims=True) + 1e-9)
    out_ref[...] = jnp.where(_topk_mask(scores, top_k), scores, 0.0).astype(out_ref.dtype)


# ---------------------------------------------------------------------------
# Wrapper
# ---------------------------------------------------------------------------
def hierarchical_expert_gating_forward(x, params, *, num_experts, num_expert_groups,
                                       top_k, use_confidence_weighting=True,
                                       block_m=None, matmul_dtype=None):
    B, S, H = x.shape
    G = num_expert_groups
    NE = num_experts
    E_pg = NE // G
    assert E_pg * G == NE
    NEP = _round_up(NE, 128)                         # lane-dense expert/output width
    HQ = max(H // 4, 1)
    HQP = _round_up(HQ, 128) if use_confidence_weighting else 0
    T = B * S
    f32 = jnp.float32
    xf = x.reshape(T, H)

    wdt = jnp.dtype(matmul_dtype) if matmul_dtype is not None else xf.dtype
    if xf.dtype != wdt:
        xf = xf.astype(wdt)                          # bf16 activations stream half bytes

    # ---- fused, lane-aligned weight layout: [experts | conf hidden | groups] ----
    we = jnp.concatenate([w.T for w in params["expert_router_weights"]], axis=1)
    we = jnp.pad(we.astype(f32), ((0, 0), (0, NEP - NE)))
    be = jnp.pad(jnp.concatenate(params["expert_router_biases"]).astype(f32).reshape(1, NE),
                 ((0, 0), (0, NEP - NE)))
    prio = jnp.pad(params["expert_priority"].astype(f32).reshape(1, NE),
                   ((0, 0), (0, NEP - NE)), constant_values=1.0)
    wg = params["group_router_weight"].T.astype(f32)             # (H, G) — last segment
    bg = params["group_router_bias"].astype(f32).reshape(1, G)

    if use_confidence_weighting:
        wc1 = jnp.pad(params["conf_w1"].T.astype(f32), ((0, 0), (0, HQP - HQ)))
        bc1 = jnp.pad(params["conf_b1"].astype(f32).reshape(1, HQ), ((0, 0), (0, HQP - HQ)))
        wc2 = jnp.pad(params["conf_w2"].T.astype(f32), ((0, HQP - HQ), (0, 0)))  # (HQP, 1)
        bc2 = params["conf_b2"].astype(f32).reshape(1, 1)
        w_all = jnp.concatenate([we, wc1, wg], axis=1)
        b_all = jnp.concatenate([be, bc1, bg], axis=1)
    else:
        wc2 = jnp.zeros((1, 1), f32)
        bc2 = jnp.zeros((1, 1), f32)
        w_all = jnp.concatenate([we, wg], axis=1)
        b_all = jnp.concatenate([be, bg], axis=1)
    w_all = w_all.astype(wdt)                        # MXU operand dtype (bf16 in prod)

    # one-hot expert->group membership (padded experts belong to no group)
    eidx = jnp.arange(NEP)
    m_mat = (jnp.logical_and((eidx[:, None] // E_pg) == jnp.arange(G)[None, :],
                             eidx[:, None] < NE)).astype(f32)     # (NEP, G)

    # ---- token tiling: >=2 grid steps (v7x dual-TC), TM multiple of 8 -----------
    if block_m is None:
        block_m = _default_block_m()
    tm = min(block_m, _round_up(T, 8))
    if T > 8 and (T + tm - 1) // tm < 2:
        tm = _round_up((T + 1) // 2, 8)
    T_pad = _round_up(T, tm)
    if T_pad != T:
        xf = jnp.pad(xf, ((0, T_pad - T), (0, 0)))

    kernel = functools.partial(
        _gating_kernel,
        num_groups=G, experts_per_group=E_pg, num_experts=NE, nep=NEP, hqp=HQP,
        top_k=top_k, top_groups=min(2, G), use_confidence=use_confidence_weighting)

    # ---- VMEM budget + cost estimate --------------------------------------------
    nbytes = lambda a: int(a.size) * a.dtype.itemsize
    weight_bytes = sum(nbytes(a) for a in (w_all, b_all, prio, m_mat, wc2, bc2))
    est = 2 * tm * H * xf.dtype.itemsize + 2 * tm * NEP * 4 + 2 * weight_bytes
    vmem_limit = int(min(max(4 * est, 32 << 20), 64 << 20))
    w_cols = int(w_all.shape[1])
    cost = pl.CostEstimate(
        flops=int(2 * T_pad * H * w_cols + 2 * T_pad * NEP * G + 2 * T_pad * max(HQP, 1)),
        transcendentals=int(T_pad * (NEP + G + HQP + 2)),
        bytes_accessed=int(T_pad * H * xf.dtype.itemsize + T_pad * NEP * 4 + weight_bytes))

    def _make_call(weight_pipeline_mode):
        def wspec(arr):
            if weight_pipeline_mode is None:
                return pl.BlockSpec(arr.shape, lambda i: (0,) * arr.ndim)
            return pl.BlockSpec(arr.shape, lambda i: (0,) * arr.ndim,
                                pipeline_mode=weight_pipeline_mode)
        return pl.pallas_call(
            kernel,
            out_shape=jax.ShapeDtypeStruct((T_pad, NEP), jnp.float32),
            grid=(T_pad // tm,),
            in_specs=[pl.BlockSpec((tm, H), lambda i: (i, 0)),
                      wspec(w_all), wspec(b_all), wspec(prio),
                      wspec(m_mat), wspec(wc2), wspec(bc2)],
            out_specs=pl.BlockSpec((tm, NEP), lambda i: (i, 0)),
            compiler_params=pltpu.CompilerParams(
                dimension_semantics=("parallel",),
                vmem_limit_bytes=vmem_limit),
            cost_estimate=cost,
        )

    args = (xf, w_all, b_all, prio, m_mat, wc2, bc2)
    try:
        # Constant-index weights never change block -> single-buffer them.
        dispatch_flat = _make_call(pl.Buffered(1))(*args)
    except Exception:
        # Fallback if this JAX/Mosaic build rejects Buffered(1) on inputs.
        dispatch_flat = _make_call(None)(*args)

    dispatch = dispatch_flat[:T, :NE].reshape(B, S, NE)
    combine = dispatch                       # combine_tensor is a clone of dispatch
    aux_loss = jnp.zeros((), jnp.float32)    # eval-mode: no load-balancing loss
    expert_metrics = {}                      # eval-mode: no metrics
    return dispatch, combine, aux_loss, expert_metrics


# ---------------------------------------------------------------------------
# Pure-JAX reference (eval-mode semantics of the PyTorch module)
# ---------------------------------------------------------------------------
def _reference(x, params, *, num_experts, num_expert_groups, top_k,
               use_confidence_weighting=True):
    B, S, H = x.shape
    G = num_expert_groups
    E_pg = num_experts // G
    xf = x.reshape(-1, H)
    T = xf.shape[0]

    conf = None
    if use_confidence_weighting:
        h = _gelu_tanh(xf @ params["conf_w1"].T + params["conf_b1"])
        conf = _sigmoid(h @ params["conf_w2"].T + params["conf_b2"])  # (T, 1)

    gl = xf @ params["group_router_weight"].T + params["group_router_bias"]
    gp = jax.nn.softmax(gl, axis=-1)
    kg = min(2, G)
    top_gp, top_gi = jax.lax.top_k(gp, kg)

    prio = params["expert_priority"]
    scores = jnp.zeros((T, num_experts), jnp.float32)
    for rank in range(kg):
        for gid in range(G):
            sel = top_gi[:, rank] == gid
            gate = jnp.where(sel, top_gp[:, rank], 0.0)[:, None]
            el = xf @ params["expert_router_weights"][gid].T \
                 + params["expert_router_biases"][gid]
            el = el * prio[gid * E_pg:(gid + 1) * E_pg][None, :]
            ep = jax.nn.softmax(el, axis=-1)
            if use_confidence_weighting:
                ep = ep * conf + (1.0 - conf) / E_pg
            k = min(top_k, E_pg)
            _, ti = jax.lax.top_k(ep, k)
            keep = jnp.sum(jax.nn.one_hot(ti, E_pg, dtype=jnp.float32), axis=1) > 0
            contrib = jnp.where(keep, ep, 0.0) * gate
            scores = scores.at[:, gid * E_pg:(gid + 1) * E_pg].add(contrib)

    scores = scores / (scores.sum(-1, keepdims=True) + 1e-9)
    _, ti = jax.lax.top_k(scores, top_k)
    keep = jnp.sum(jax.nn.one_hot(ti, num_experts, dtype=jnp.float32), axis=1) > 0
    disp = jnp.where(keep, scores, 0.0).reshape(B, S, num_experts)
    return disp, disp


# ---------------------------------------------------------------------------
if __name__ == "__main__":
    B, S, H = 2, 8, 32
    num_experts, G, top_k = 8, 4, 2
    E_pg = num_experts // G

    key = jax.random.PRNGKey(0)
    keys = jax.random.split(key, 10)

    def lin_init(k, out_f, in_f):
        bound = 1.0 / math.sqrt(in_f)
        kw, kb = jax.random.split(k)
        w = jax.random.uniform(kw, (out_f, in_f), jnp.float32, -bound, bound)
        b = jax.random.uniform(kb, (out_f,), jnp.float32, -bound, bound)
        return w, b

    gw, gb = lin_init(keys[0], G, H)
    ew_list, eb_list = [], []
    for g in range(G):
        w, b = lin_init(keys[1 + g], E_pg, H)
        ew_list.append(w)
        eb_list.append(b)
    cw1, cb1 = lin_init(keys[5], H // 4, H)
    cw2, cb2 = lin_init(keys[6], 1, H // 4)

    prio = jnp.ones((num_experts,), jnp.float32)
    prio = prio.at[jnp.arange(0, num_experts, E_pg)].set(1.2)

    params = dict(group_router_weight=gw, group_router_bias=gb,
                  expert_router_weights=ew_list, expert_router_biases=eb_list,
                  conf_w1=cw1, conf_b1=cb1, conf_w2=cw2, conf_b2=cb2,
                  expert_priority=prio)

    x = jax.random.normal(keys[7], (B, S, H), jnp.float32)

    disp, comb, aux, metrics = hierarchical_expert_gating_forward(
        x, params, num_experts=num_experts, num_expert_groups=G, top_k=top_k)
    disp, comb, aux = jax.block_until_ready((disp, comb, aux))

    ref_disp, ref_comb = _reference(x, params, num_experts=num_experts,
                                    num_expert_groups=G, top_k=top_k)

    assert disp.shape == (B, S, num_experts)
    assert comb.shape == (B, S, num_experts)
    assert jnp.allclose(disp, ref_disp, atol=1e-5, rtol=2e-4)
    assert jnp.allclose(comb, ref_comb, atol=1e-5, rtol=2e-4)
    # Each token dispatches to at most top_k experts, weights sum to ~1.
    assert int(jnp.max(jnp.sum(disp > 0, axis=-1))) <= top_k

    print("KERNEL_OK")
</pallas_src>

<mosaic_0001>
module attributes {stable_mosaic.version = 11 : i64} {
  func.func @_gating_kernel(%arg0: i32, %arg1: memref<8x32xf32, #tpu.memory_space<vmem>>, %arg2: memref<32x260xf32, #tpu.memory_space<vmem>>, %arg3: memref<1x260xf32, #tpu.memory_space<vmem>>, %arg4: memref<1x128xf32, #tpu.memory_space<vmem>>, %arg5: memref<128x4xf32, #tpu.memory_space<vmem>>, %arg6: memref<128x1xf32, #tpu.memory_space<vmem>>, %arg7: memref<1x1xf32, #tpu.memory_space<vmem>>, %arg8: memref<8x128xf32, #tpu.memory_space<vmem>>) attributes {dimension_semantics = [#tpu.dimension_semantics<parallel>], iteration_bounds = array<i64: 2>, scalar_prefetch = 0 : i64, scratch_operands = 0 : i64, tpu.core_type = #tpu.core_type<tc>, window_params = [{transform_indices = @transform_0, window_bounds = array<i64: 8, 32>}, {pipeline_mode = #tpu.pipeline_mode<synchronous>, transform_indices = @transform_1, window_bounds = array<i64: 32, 260>}, {pipeline_mode = #tpu.pipeline_mode<synchronous>, transform_indices = @transform_2, window_bounds = array<i64: 1, 260>}, {pipeline_mode = #tpu.pipeline_mode<synchronous>, transform_indices = @transform_3, window_bounds = array<i64: 1, 128>}, {pipeline_mode = #tpu.pipeline_mode<synchronous>, transform_indices = @transform_4, window_bounds = array<i64: 128, 4>}, {pipeline_mode = #tpu.pipeline_mode<synchronous>, transform_indices = @transform_5, window_bounds = array<i64: 128, 1>}, {pipeline_mode = #tpu.pipeline_mode<synchronous>, transform_indices = @transform_6, window_bounds = array<i64: 1, 1>}, {transform_indices = @transform_7, window_bounds = array<i64: 8, 128>}]} {
    %c0 = arith.constant 0 : index
    %c0_0 = arith.constant 0 : index
    %0 = vector.load %arg1[%c0, %c0_0] : memref<8x32xf32, #tpu.memory_space<vmem>>, vector<8x32xf32>
    %c0_1 = arith.constant 0 : index
    %c0_2 = arith.constant 0 : index
    %1 = vector.load %arg2[%c0_1, %c0_2] : memref<32x260xf32, #tpu.memory_space<vmem>>, vector<32x260xf32>
    %cst = arith.constant dense<0.000000e+00> : vector<8x260xf32>
    %2 = tpu.matmul %0, %1, %cst {dimension_numbers = #tpu.dot_dimension_numbers<[1], [0], [0], [1], [0, 0, 1, 1], [], []>} : vector<8x32xf32>, vector<32x260xf32>, vector<8x260xf32> -> vector<8x260xf32>
    %c0_3 = arith.constant 0 : index
    %c0_4 = arith.constant 0 : index
    %3 = vector.load %arg3[%c0_3, %c0_4] : memref<1x260xf32, #tpu.memory_space<vmem>>, vector<1x260xf32>
    %4 = vector.broadcast %3 : vector<1x260xf32> to vector<8x260xf32>
    %5 = arith.addf %2, %4 : vector<8x260xf32>
    %6 = vector.extract_strided_slice %5 {offsets = [0, 0], sizes = [8, 128], strides = [1, 1]} : vector<8x260xf32> to vector<8x128xf32>
    %c0_5 = arith.constant 0 : index
    %c0_6 = arith.constant 0 : index
    %7 = vector.load %arg4[%c0_5, %c0_6] : memref<1x128xf32, #tpu.memory_space<vmem>>, vector<1x128xf32>
    %8 = vector.broadcast %7 : vector<1x128xf32> to vector<8x128xf32>
    %9 = arith.mulf %6, %8 : vector<8x128xf32>
    %10 = vector.extract_strided_slice %5 {offsets = [0, 256], sizes = [8, 4], strides = [1, 1]} : vector<8x260xf32> to vector<8x4xf32>
    %11 = vector.extract_strided_slice %5 {offsets = [0, 128], sizes = [8, 128], strides = [1, 1]} : vector<8x260xf32> to vector<8x128xf32>
    %cst_7 = arith.constant 5.000000e-01 : f32
    %12 = vector.broadcast %cst_7 : f32 to vector<8x128xf32>
    %13 = arith.mulf %12, %11 : vector<8x128xf32>
    %cst_8 = arith.constant 4.471500e-02 : f32
    %14 = vector.broadcast %cst_8 : f32 to vector<8x128xf32>
    %15 = arith.mulf %14, %11 : vector<8x128xf32>
    %16 = arith.mulf %15, %11 : vector<8x128xf32>
    %17 = arith.mulf %16, %11 : vector<8x128xf32>
    %18 = arith.addf %11, %17 : vector<8x128xf32>
    %cst_9 = arith.constant 0.797884583 : f32
    %19 = vector.broadcast %cst_9 : f32 to vector<8x128xf32>
    %20 = arith.mulf %19, %18 : vector<8x128xf32>
    %21 = math.tanh %20 : vector<8x128xf32>
    %cst_10 = arith.constant 1.000000e+00 : f32
    %22 = vector.broadcast %cst_10 : f32 to vector<8x128xf32>
    %23 = arith.addf %22, %21 : vector<8x128xf32>
    %24 = arith.mulf %13, %23 : vector<8x128xf32>
    %c0_11 = arith.constant 0 : index
    %c0_12 = arith.constant 0 : index
    %25 = vector.load %arg6[%c0_11, %c0_12] : memref<128x1xf32, #tpu.memory_space<vmem>>, vector<128x1xf32>
    %cst_13 = arith.constant dense<0.000000e+00> : vector<8x1xf32>
    %26 = tpu.matmul %24, %25, %cst_13 {dimension_numbers = #tpu.dot_dimension_numbers<[1], [0], [0], [1], [0, 0, 1, 1], [], []>} : vector<8x128xf32>, vector<128x1xf32>, vector<8x1xf32> -> vector<8x1xf32>
    %c0_14 = arith.constant 0 : index
    %c0_15 = arith.constant 0 : index
    %27 = vector.load %arg7[%c0_14, %c0_15] : memref<1x1xf32, #tpu.memory_space<vmem>>, vector<1x1xf32>
    %28 = vector.broadcast %27 : vector<1x1xf32> to vector<8x1xf32>
    %29 = arith.addf %26, %28 : vector<8x1xf32>
    %cst_16 = arith.constant 0.000000e+00 : f32
    %30 = vector.broadcast %cst_16 : f32 to vector<8x1xf32>
    %31 = arith.subf %30, %29 : vector<8x1xf32>
    %32 = math.exp %31 : vector<8x1xf32>
    %cst_17 = arith.constant 1.000000e+00 : f32
    %33 = vector.broadcast %cst_17 : f32 to vector<8x1xf32>
    %34 = arith.addf %33, %32 : vector<8x1xf32>
    %cst_18 = arith.constant 1.000000e+00 : f32
    %35 = vector.broadcast %cst_18 : f32 to vector<8x1xf32>
    %36 = arith.divf %35, %34 : vector<8x1xf32>
    %cst_19 = arith.constant dense<0xFF800000> : vector<8xf32>
    %37 = vector.multi_reduction <maximumf>, %10, %cst_19 [1] : vector<8x4xf32> to vector<8xf32>
    %38 = vector.shape_cast %37 : vector<8xf32> to vector<8x1xf32>
    %39 = vector.broadcast %38 : vector<8x1xf32> to vector<8x4xf32>
    %40 = arith.subf %10, %39 : vector<8x4xf32>
    %41 = math.exp %40 : vector<8x4xf32>
    %cst_20 = arith.constant dense<0.000000e+00> : vector<8xf32>
    %42 = vector.multi_reduction <add>, %41, %cst_20 [1] : vector<8x4xf32> to vector<8xf32>
    %43 = vector.shape_cast %42 : vector<8xf32> to vector<8x1xf32>
    %44 = tpu.reciprocal %43 : vector<8x1xf32> -> vector<8x1xf32>
    %45 = vector.broadcast %44 : vector<8x1xf32> to vector<8x4xf32>
    %46 = arith.mulf %41, %45 : vector<8x4xf32>
    %47 = tpu.iota {dimensions = array<i32: 1>} : vector<8x4xi32>
    %48 = arith.sitofp %47 : vector<8x4xi32> to vector<8x4xf32>
    %cst_21 = arith.constant dense<0xFF800000> : vector<8xf32>
    %49 = vector.multi_reduction <maximumf>, %46, %cst_21 [1] : vector<8x4xf32> to vector<8xf32>
    %50 = vector.shape_cast %49 : vector<8xf32> to vector<8x1xf32>
    %51 = vector.broadcast %50 : vector<8x1xf32> to vector<8x4xf32>
    %52 = arith.cmpf oeq, %46, %51 : vector<8x4xf32>
    %cst_22 = arith.constant 4.000000e+00 : f32
    %53 = vector.broadcast %cst_22 : f32 to vector<8x4xf32>
    %54 = arith.select %52, %48, %53 : vector<8x4xi1>, vector<8x4xf32>
    %cst_23 = arith.constant dense<0x7F800000> : vector<8xf32>
    %55 = vector.multi_reduction <minimumf>, %54, %cst_23 [1] : vector<8x4xf32> to vector<8xf32>
    %56 = vector.shape_cast %55 : vector<8xf32> to vector<8x1xf32>
    %57 = vector.broadcast %56 : vector<8x1xf32> to vector<8x4xf32>
    %58 = arith.cmpf oeq, %48, %57 : vector<8x4xf32>
    %cst_24 = arith.constant -1.000000e+30 : f32
    %59 = vector.broadcast %cst_24 : f32 to vector<8x4xf32>
    %60 = arith.select %58, %59, %46 : vector<8x4xi1>, vector<8x4xf32>
    %cst_25 = arith.constant dense<0xFF800000> : vector<8xf32>
    %61 = vector.multi_reduction <maximumf>, %60, %cst_25 [1] : vector<8x4xf32> to vector<8xf32>
    %62 = vector.shape_cast %61 : vector<8xf32> to vector<8x1xf32>
    %63 = vector.broadcast %62 : vector<8x1xf32> to vector<8x4xf32>
    %64 = arith.cmpf oeq, %60, %63 : vector<8x4xf32>
    %cst_26 = arith.constant 4.000000e+00 : f32
    %65 = vector.broadcast %cst_26 : f32 to vector<8x4xf32>
    %66 = arith.select %64, %48, %65 : vector<8x4xi1>, vector<8x4xf32>
    %cst_27 = arith.constant dense<0x7F800000> : vector<8xf32>
    %67 = vector.multi_reduction <minimumf>, %66, %cst_27 [1] : vector<8x4xf32> to vector<8xf32>
    %68 = vector.shape_cast %67 : vector<8xf32> to vector<8x1xf32>
    %69 = vector.broadcast %68 : vector<8x1xf32> to vector<8x4xf32>
    %70 = arith.cmpf oeq, %48, %69 : vector<8x4xf32>
    %71 = arith.ori %58, %70 : vector<8x4xi1>
    %cst_28 = arith.constant 0.000000e+00 : f32
    %72 = vector.broadcast %cst_28 : f32 to vector<8x4xf32>
    %73 = arith.select %71, %46, %72 : vector<8x4xi1>, vector<8x4xf32>
    %74 = tpu.iota {dimensions = array<i32: 1>} : vector<8x128xi32>
    %c8_i32 = arith.constant 8 : i32
    %75 = vector.broadcast %c8_i32 : i32 to vector<8x128xi32>
    %76 = arith.cmpi slt, %74, %75 : vector<8x128xi32>
    %cst_29 = arith.constant -1.000000e+30 : f32
    %77 = vector.broadcast %cst_29 : f32 to vector<8x128xf32>
    %78 = arith.select %76, %9, %77 : vector<8x128xi1>, vector<8x128xf32>
    %cst_30 = arith.constant dense<0xFF800000> : vector<8xf32>
    %79 = vector.multi_reduction <maximumf>, %78, %cst_30 [1] : vector<8x128xf32> to vector<8xf32>
    %80 = vector.shape_cast %79 : vector<8xf32> to vector<8x1xf32>
    %81 = vector.broadcast %80 : vector<8x1xf32> to vector<8x128xf32>
    %82 = arith.subf %78, %81 : vector<8x128xf32>
    %83 = math.exp %82 : vector<8x128xf32>
    %c0_i32 = arith.constant 0 : i32
    %84 = vector.broadcast %c0_i32 : i32 to vector<8x128xi32>
    %85 = arith.cmpi sge, %74, %84 : vector<8x128xi32>
    %c2_i32 = arith.constant 2 : i32
    %86 = vector.broadcast %c2_i32 : i32 to vector<8x128xi32>
    %87 = arith.cmpi slt, %74, %86 : vector<8x128xi32>
    %88 = arith.andi %85, %87 : vector<8x128xi1>
    %c2_i32_31 = arith.constant 2 : i32
    %89 = vector.broadcast %c2_i32_31 : i32 to vector<8x128xi32>
    %90 = arith.cmpi sge, %74, %89 : vector<8x128xi32>
    %c4_i32 = arith.constant 4 : i32
    %91 = vector.broadcast %c4_i32 : i32 to vector<8x128xi32>
    %92 = arith.cmpi slt, %74, %91 : vector<8x128xi32>
    %93 = arith.andi %90, %92 : vector<8x128xi1>
    %c4_i32_32 = arith.constant 4 : i32
    %94 = vector.broadcast %c4_i32_32 : i32 to vector<8x128xi32>
    %95 = arith.cmpi sge, %74, %94 : vector<8x128xi32>
    %c6_i32 = arith.constant 6 : i32
    %96 = vector.broadcast %c6_i32 : i32 to vector<8x128xi32>
    %97 = arith.cmpi slt, %74, %96 : vector<8x128xi32>
    %98 = arith.andi %95, %97 : vector<8x128xi1>
    %c6_i32_33 = arith.constant 6 : i32
    %99 = vector.broadcast %c6_i32_33 : i32 to vector<8x128xi32>
    %100 = arith.cmpi sge, %74, %99 : vector<8x128xi32>
    %c8_i32_34 = arith.constant 8 : i32
    %101 = vector.broadcast %c8_i32_34 : i32 to vector<8x128xi32>
    %102 = arith.cmpi slt, %74, %101 : vector<8x128xi32>
    %103 = arith.andi %100, %102 : vector<8x128xi1>
    %c0_35 = arith.constant 0 : index
    %c0_36 = arith.constant 0 : index
    %104 = vector.load %arg5[%c0_35, %c0_36] : memref<128x4xf32, #tpu.memory_space<vmem>>, vector<128x4xf32>
    %cst_37 = arith.constant dense<0.000000e+00> : vector<8x4xf32>
    %105 = tpu.matmul %83, %104, %cst_37 {dimension_numbers = #tpu.dot_dimension_numbers<[1], [0], [0], [1], [0, 0, 1, 1], [], []>} : vector<8x128xf32>, vector<128x4xf32>, vector<8x4xf32> -> vector<8x4xf32>
    %106 = vector.extract_strided_slice %105 {offsets = [0, 0], sizes = [8, 1], strides = [1, 1]} : vector<8x4xf32> to vector<8x1xf32>
    %cst_38 = arith.constant 0.000000e+00 : f32
    %107 = vector.shape_cast %106 : vector<8x1xf32> to vector<8x1xf32>
    %108 = vector.broadcast %107 : vector<8x1xf32> to vector<8x128xf32>
    %109 = vector.broadcast %cst_38 : f32 to vector<8x128xf32>
    %110 = arith.select %88, %108, %109 : vector<8x128xi1>, vector<8x128xf32>
    %111 = vector.extract_strided_slice %105 {offsets = [0, 1], sizes = [8, 1], strides = [1, 1]} : vector<8x4xf32> to vector<8x1xf32>
    %cst_39 = arith.constant 0.000000e+00 : f32
    %112 = vector.shape_cast %111 : vector<8x1xf32> to vector<8x1xf32>
    %113 = vector.broadcast %112 : vector<8x1xf32> to vector<8x128xf32>
    %114 = vector.broadcast %cst_39 : f32 to vector<8x128xf32>
    %115 = arith.select %93, %113, %114 : vector<8x128xi1>, vector<8x128xf32>
    %116 = arith.addf %110, %115 : vector<8x128xf32>
    %117 = vector.extract_strided_slice %105 {offsets = [0, 2], sizes = [8, 1], strides = [1, 1]} : vector<8x4xf32> to vector<8x1xf32>
    %cst_40 = arith.constant 0.000000e+00 : f32
    %118 = vector.shape_cast %117 : vector<8x1xf32> to vector<8x1xf32>
    %119 = vector.broadcast %118 : vector<8x1xf32> to vector<8x128xf32>
    %120 = vector.broadcast %cst_40 : f32 to vector<8x128xf32>
    %121 = arith.select %98, %119, %120 : vector<8x128xi1>, vector<8x128xf32>
    %122 = arith.addf %116, %121 : vector<8x128xf32>
    %123 = vector.extract_strided_slice %105 {offsets = [0, 3], sizes = [8, 1], strides = [1, 1]} : vector<8x4xf32> to vector<8x1xf32>
    %cst_41 = arith.constant 0.000000e+00 : f32
    %124 = vector.shape_cast %123 : vector<8x1xf32> to vector<8x1xf32>
    %125 = vector.broadcast %124 : vector<8x1xf32> to vector<8x128xf32>
    %126 = vector.broadcast %cst_41 : f32 to vector<8x128xf32>
    %127 = arith.select %103, %125, %126 : vector<8x128xi1>, vector<8x128xf32>
    %128 = arith.addf %122, %127 : vector<8x128xf32>
    %cst_42 = arith.constant 1.000000e-30 : f32
    %129 = vector.broadcast %cst_42 : f32 to vector<8x128xf32>
    %130 = arith.addf %128, %129 : vector<8x128xf32>
    %131 = tpu.reciprocal %130 : vector<8x128xf32> -> vector<8x128xf32>
    %132 = arith.mulf %83, %131 : vector<8x128xf32>
    %133 = vector.broadcast %36 : vector<8x1xf32> to vector<8x128xf32>
    %134 = arith.mulf %132, %133 : vector<8x128xf32>
    %cst_43 = arith.constant 1.000000e+00 : f32
    %135 = vector.broadcast %cst_43 : f32 to vector<8x1xf32>
    %136 = arith.subf %135, %36 : vector<8x1xf32>
    %cst_44 = arith.constant 5.000000e-01 : f32
    %137 = vector.broadcast %cst_44 : f32 to vector<8x1xf32>
    %138 = arith.mulf %136, %137 : vector<8x1xf32>
    %139 = vector.broadcast %138 : vector<8x1xf32> to vector<8x128xf32>
    %140 = arith.addf %134, %139 : vector<8x128xf32>
    %cst_45 = arith.constant -1.000000e+30 : f32
    %141 = vector.broadcast %cst_45 : f32 to vector<8x128xf32>
    %142 = arith.select %88, %140, %141 : vector<8x128xi1>, vector<8x128xf32>
    %143 = tpu.iota {dimensions = array<i32: 1>} : vector<8x128xi32>
    %144 = arith.sitofp %143 : vector<8x128xi32> to vector<8x128xf32>
    %cst_46 = arith.constant dense<0xFF800000> : vector<8xf32>
    %145 = vector.multi_reduction <maximumf>, %142, %cst_46 [1] : vector<8x128xf32> to vector<8xf32>
    %146 = vector.shape_cast %145 : vector<8xf32> to vector<8x1xf32>
    %147 = vector.broadcast %146 : vector<8x1xf32> to vector<8x128xf32>
    %148 = arith.cmpf oeq, %142, %147 : vector<8x128xf32>
    %cst_47 = arith.constant 1.280000e+02 : f32
    %149 = vector.broadcast %cst_47 : f32 to vector<8x128xf32>
    %150 = arith.select %148, %144, %149 : vector<8x128xi1>, vector<8x128xf32>
    %cst_48 = arith.constant dense<0x7F800000> : vector<8xf32>
    %151 = vector.multi_reduction <minimumf>, %150, %cst_48 [1] : vector<8x128xf32> to vector<8xf32>
    %152 = vector.shape_cast %151 : vector<8xf32> to vector<8x1xf32>
    %153 = vector.broadcast %152 : vector<8x1xf32> to vector<8x128xf32>
    %154 = arith.cmpf oeq, %144, %153 : vector<8x128xf32>
    %cst_49 = arith.constant -1.000000e+30 : f32
    %155 = vector.broadcast %cst_49 : f32 to vector<8x128xf32>
    %156 = arith.select %154, %155, %142 : vector<8x128xi1>, vector<8x128xf32>
    %cst_50 = arith.constant dense<0xFF800000> : vector<8xf32>
    %157 = vector.multi_reduction <maximumf>, %156, %cst_50 [1] : vector<8x128xf32> to vector<8xf32>
    %158 = vector.shape_cast %157 : vector<8xf32> to vector<8x1xf32>
    %159 = vector.broadcast %158 : vector<8x1xf32> to vector<8x128xf32>
    %160 = arith.cmpf oeq, %156, %159 : vector<8x128xf32>
    %cst_51 = arith.constant 1.280000e+02 : f32
    %161 = vector.broadcast %cst_51 : f32 to vector<8x128xf32>
    %162 = arith.select %160, %144, %161 : vector<8x128xi1>, vector<8x128xf32>
    %cst_52 = arith.constant dense<0x7F800000> : vector<8xf32>
    %163 = vector.multi_reduction <minimumf>, %162, %cst_52 [1] : vector<8x128xf32> to vector<8xf32>
    %164 = vector.shape_cast %163 : vector<8xf32> to vector<8x1xf32>
    %165 = vector.broadcast %164 : vector<8x1xf32> to vector<8x128xf32>
    %166 = arith.cmpf oeq, %144, %165 : vector<8x128xf32>
    %167 = arith.ori %154, %166 : vector<8x128xi1>
    %168 = vector.extract_strided_slice %73 {offsets = [0, 0], sizes = [8, 1], strides = [1, 1]} : vector<8x4xf32> to vector<8x1xf32>
    %cst_53 = arith.constant 0.000000e+00 : f32
    %169 = vector.shape_cast %168 : vector<8x1xf32> to vector<8x1xf32>
    %170 = vector.broadcast %169 : vector<8x1xf32> to vector<8x128xf32>
    %171 = vector.broadcast %cst_53 : f32 to vector<8x128xf32>
    %172 = arith.select %88, %170, %171 : vector<8x128xi1>, vector<8x128xf32>
    %cst_54 = arith.constant -1.000000e+30 : f32
    %173 = vector.broadcast %cst_54 : f32 to vector<8x128xf32>
    %174 = arith.select %93, %140, %173 : vector<8x128xi1>, vector<8x128xf32>
    %175 = tpu.iota {dimensions = array<i32: 1>} : vector<8x128xi32>
    %176 = arith.sitofp %175 : vector<8x128xi32> to vector<8x128xf32>
    %cst_55 = arith.constant dense<0xFF800000> : vector<8xf32>
    %177 = vector.multi_reduction <maximumf>, %174, %cst_55 [1] : vector<8x128xf32> to vector<8xf32>
    %178 = vector.shape_cast %177 : vector<8xf32> to vector<8x1xf32>
    %179 = vector.broadcast %178 : vector<8x1xf32> to vector<8x128xf32>
    %180 = arith.cmpf oeq, %174, %179 : vector<8x128xf32>
    %cst_56 = arith.constant 1.280000e+02 : f32
    %181 = vector.broadcast %cst_56 : f32 to vector<8x128xf32>
    %182 = arith.select %180, %176, %181 : vector<8x128xi1>, vector<8x128xf32>
    %cst_57 = arith.constant dense<0x7F800000> : vector<8xf32>
    %183 = vector.multi_reduction <minimumf>, %182, %cst_57 [1] : vector<8x128xf32> to vector<8xf32>
    %184 = vector.shape_cast %183 : vector<8xf32> to vector<8x1xf32>
    %185 = vector.broadcast %184 : vector<8x1xf32> to vector<8x128xf32>
    %186 = arith.cmpf oeq, %176, %185 : vector<8x128xf32>
    %cst_58 = arith.constant -1.000000e+30 : f32
    %187 = vector.broadcast %cst_58 : f32 to vector<8x128xf32>
    %188 = arith.select %186, %187, %174 : vector<8x128xi1>, vector<8x128xf32>
    %cst_59 = arith.constant dense<0xFF800000> : vector<8xf32>
    %189 = vector.multi_reduction <maximumf>, %188, %cst_59 [1] : vector<8x128xf32> to vector<8xf32>
    %190 = vector.shape_cast %189 : vector<8xf32> to vector<8x1xf32>
    %191 = vector.broadcast %190 : vector<8x1xf32> to vector<8x128xf32>
    %192 = arith.cmpf oeq, %188, %191 : vector<8x128xf32>
    %cst_60 = arith.constant 1.280000e+02 : f32
    %193 = vector.broadcast %cst_60 : f32 to vector<8x128xf32>
    %194 = arith.select %192, %176, %193 : vector<8x128xi1>, vector<8x128xf32>
    %cst_61 = arith.constant dense<0x7F800000> : vector<8xf32>
    %195 = vector.multi_reduction <minimumf>, %194, %cst_61 [1] : vector<8x128xf32> to vector<8xf32>
    %196 = vector.shape_cast %195 : vector<8xf32> to vector<8x1xf32>
    %197 = vector.broadcast %196 : vector<8x1xf32> to vector<8x128xf32>
    %198 = arith.cmpf oeq, %176, %197 : vector<8x128xf32>
    %199 = arith.ori %186, %198 : vector<8x128xi1>
    %200 = arith.ori %167, %199 : vector<8x128xi1>
    %201 = vector.extract_strided_slice %73 {offsets = [0, 1], sizes = [8, 1], strides = [1, 1]} : vector<8x4xf32> to vector<8x1xf32>
    %cst_62 = arith.constant 0.000000e+00 : f32
    %202 = vector.shape_cast %201 : vector<8x1xf32> to vector<8x1xf32>
    %203 = vector.broadcast %202 : vector<8x1xf32> to vector<8x128xf32>
    %204 = vector.broadcast %cst_62 : f32 to vector<8x128xf32>
    %205 = arith.select %93, %203, %204 : vector<8x128xi1>, vector<8x128xf32>
    %206 = arith.addf %172, %205 : vector<8x128xf32>
    %cst_63 = arith.constant -1.000000e+30 : f32
    %207 = vector.broadcast %cst_63 : f32 to vector<8x128xf32>
    %208 = arith.select %98, %140, %207 : vector<8x128xi1>, vector<8x128xf32>
    %209 = tpu.iota {dimensions = array<i32: 1>} : vector<8x128xi32>
    %210 = arith.sitofp %209 : vector<8x128xi32> to vector<8x128xf32>
    %cst_64 = arith.constant dense<0xFF800000> : vector<8xf32>
    %211 = vector.multi_reduction <maximumf>, %208, %cst_64 [1] : vector<8x128xf32> to vector<8xf32>
    %212 = vector.shape_cast %211 : vector<8xf32> to vector<8x1xf32>
    %213 = vector.broadcast %212 : vector<8x1xf32> to vector<8x128xf32>
    %214 = arith.cmpf oeq, %208, %213 : vector<8x128xf32>
    %cst_65 = arith.constant 1.280000e+02 : f32
    %215 = vector.broadcast %cst_65 : f32 to vector<8x128xf32>
    %216 = arith.select %214, %210, %215 : vector<8x128xi1>, vector<8x128xf32>
    %cst_66 = arith.constant dense<0x7F800000> : vector<8xf32>
    %217 = vector.multi_reduction <minimumf>, %216, %cst_66 [1] : vector<8x128xf32> to vector<8xf32>
    %218 = vector.shape_cast %217 : vector<8xf32> to vector<8x1xf32>
    %219 = vector.broadcast %218 : vector<8x1xf32> to vector<8x128xf32>
    %220 = arith.cmpf oeq, %210, %219 : vector<8x128xf32>
    %cst_67 = arith.constant -1.000000e+30 : f32
    %221 = vector.broadcast %cst_67 : f32 to vector<8x128xf32>
    %222 = arith.select %220, %221, %208 : vector<8x128xi1>, vector<8x128xf32>
    %cst_68 = arith.constant dense<0xFF800000> : vector<8xf32>
    %223 = vector.multi_reduction <maximumf>, %222, %cst_68 [1] : vector<8x128xf32> to vector<8xf32>
    %224 = vector.shape_cast %223 : vector<8xf32> to vector<8x1xf32>
    %225 = vector.broadcast %224 : vector<8x1xf32> to vector<8x128xf32>
    %226 = arith.cmpf oeq, %222, %225 : vector<8x128xf32>
    %cst_69 = arith.constant 1.280000e+02 : f32
    %227 = vector.broadcast %cst_69 : f32 to vector<8x128xf32>
    %228 = arith.select %226, %210, %227 : vector<8x128xi1>, vector<8x128xf32>
    %cst_70 = arith.constant dense<0x7F800000> : vector<8xf32>
    %229 = vector.multi_reduction <minimumf>, %228, %cst_70 [1] : vector<8x128xf32> to vector<8xf32>
    %230 = vector.shape_cast %229 : vector<8xf32> to vector<8x1xf32>
    %231 = vector.broadcast %230 : vector<8x1xf32> to vector<8x128xf32>
    %232 = arith.cmpf oeq, %210, %231 : vector<8x128xf32>
    %233 = arith.ori %220, %232 : vector<8x128xi1>
    %234 = arith.ori %200, %233 : vector<8x128xi1>
    %235 = vector.extract_strided_slice %73 {offsets = [0, 2], sizes = [8, 1], strides = [1, 1]} : vector<8x4xf32> to vector<8x1xf32>
    %cst_71 = arith.constant 0.000000e+00 : f32
    %236 = vector.shape_cast %235 : vector<8x1xf32> to vector<8x1xf32>
    %237 = vector.broadcast %236 : vector<8x1xf32> to vector<8x128xf32>
    %238 = vector.broadcast %cst_71 : f32 to vector<8x128xf32>
    %239 = arith.select %98, %237, %238 : vector<8x128xi1>, vector<8x128xf32>
    %240 = arith.addf %206, %239 : vector<8x128xf32>
    %cst_72 = arith.constant -1.000000e+30 : f32
    %241 = vector.broadcast %cst_72 : f32 to vector<8x128xf32>
    %242 = arith.select %103, %140, %241 : vector<8x128xi1>, vector<8x128xf32>
    %243 = tpu.iota {dimensions = array<i32: 1>} : vector<8x128xi32>
    %244 = arith.sitofp %243 : vector<8x128xi32> to vector<8x128xf32>
    %cst_73 = arith.constant dense<0xFF800000> : vector<8xf32>
    %245 = vector.multi_reduction <maximumf>, %242, %cst_73 [1] : vector<8x128xf32> to vector<8xf32>
    %246 = vector.shape_cast %245 : vector<8xf32> to vector<8x1xf32>
    %247 = vector.broadcast %246 : vector<8x1xf32> to vector<8x128xf32>
    %248 = arith.cmpf oeq, %242, %247 : vector<8x128xf32>
    %cst_74 = arith.constant 1.280000e+02 : f32
    %249 = vector.broadcast %cst_74 : f32 to vector<8x128xf32>
    %250 = arith.select %248, %244, %249 : vector<8x128xi1>, vector<8x128xf32>
    %cst_75 = arith.constant dense<0x7F800000> : vector<8xf32>
    %251 = vector.multi_reduction <minimumf>, %250, %cst_75 [1] : vector<8x128xf32> to vector<8xf32>
    %252 = vector.shape_cast %251 : vector<8xf32> to vector<8x1xf32>
    %253 = vector.broadcast %252 : vector<8x1xf32> to vector<8x128xf32>
    %254 = arith.cmpf oeq, %244, %253 : vector<8x128xf32>
    %cst_76 = arith.constant -1.000000e+30 : f32
    %255 = vector.broadcast %cst_76 : f32 to vector<8x128xf32>
    %256 = arith.select %254, %255, %242 : vector<8x128xi1>, vector<8x128xf32>
    %cst_77 = arith.constant dense<0xFF800000> : vector<8xf32>
    %257 = vector.multi_reduction <maximumf>, %256, %cst_77 [1] : vector<8x128xf32> to vector<8xf32>
    %258 = vector.shape_cast %257 : vector<8xf32> to vector<8x1xf32>
    %259 = vector.broadcast %258 : vector<8x1xf32> to vector<8x128xf32>
    %260 = arith.cmpf oeq, %256, %259 : vector<8x128xf32>
    %cst_78 = arith.constant 1.280000e+02 : f32
    %261 = vector.broadcast %cst_78 : f32 to vector<8x128xf32>
    %262 = arith.select %260, %244, %261 : vector<8x128xi1>, vector<8x128xf32>
    %cst_79 = arith.constant dense<0x7F800000> : vector<8xf32>
    %263 = vector.multi_reduction <minimumf>, %262, %cst_79 [1] : vector<8x128xf32> to vector<8xf32>
    %264 = vector.shape_cast %263 : vector<8xf32> to vector<8x1xf32>
    %265 = vector.broadcast %264 : vector<8x1xf32> to vector<8x128xf32>
    %266 = arith.cmpf oeq, %244, %265 : vector<8x128xf32>
    %267 = arith.ori %254, %266 : vector<8x128xi1>
    %268 = arith.ori %234, %267 : vector<8x128xi1>
    %269 = vector.extract_strided_slice %73 {offsets = [0, 3], sizes = [8, 1], strides = [1, 1]} : vector<8x4xf32> to vector<8x1xf32>
    %cst_80 = arith.constant 0.000000e+00 : f32
    %270 = vector.shape_cast %269 : vector<8x1xf32> to vector<8x1xf32>
    %271 = vector.broadcast %270 : vector<8x1xf32> to vector<8x128xf32>
    %272 = vector.broadcast %cst_80 : f32 to vector<8x128xf32>
    %273 = arith.select %103, %271, %272 : vector<8x128xi1>, vector<8x128xf32>
    %274 = arith.addf %240, %273 : vector<8x128xf32>
    %cst_81 = arith.constant 0.000000e+00 : f32
    %275 = vector.broadcast %cst_81 : f32 to vector<8x128xf32>
    %276 = arith.select %268, %140, %275 : vector<8x128xi1>, vector<8x128xf32>
    %277 = arith.mulf %276, %274 : vector<8x128xf32>
    %cst_82 = arith.constant dense<0.000000e+00> : vector<8xf32>
    %278 = vector.multi_reduction <add>, %277, %cst_82 [1] : vector<8x128xf32> to vector<8xf32>
    %279 = vector.shape_cast %278 : vector<8xf32> to vector<8x1xf32>
    %cst_83 = arith.constant 9.99999971E-10 : f32
    %280 = vector.broadcast %cst_83 : f32 to vector<8x1xf32>
    %281 = arith.addf %279, %280 : vector<8x1xf32>
    %282 = tpu.reciprocal %281 : vector<8x1xf32> -> vector<8x1xf32>
    %283 = vector.broadcast %282 : vector<8x1xf32> to vector<8x128xf32>
    %284 = arith.mulf %277, %283 : vector<8x128xf32>
    %285 = tpu.iota {dimensions = array<i32: 1>} : vector<8x128xi32>
    %286 = arith.sitofp %285 : vector<8x128xi32> to vector<8x128xf32>
    %cst_84 = arith.constant dense<0xFF800000> : vector<8xf32>
    %287 = vector.multi_reduction <maximumf>, %284, %cst_84 [1] : vector<8x128xf32> to vector<8xf32>
    %288 = vector.shape_cast %287 : vector<8xf32> to vector<8x1xf32>
    %289 = vector.broadcast %288 : vector<8x1xf32> to vector<8x128xf32>
    %290 = arith.cmpf oeq, %284, %289 : vector<8x128xf32>
    %cst_85 = arith.constant 1.280000e+02 : f32
    %291 = vector.broadcast %cst_85 : f32 to vector<8x128xf32>
    %292 = arith.select %290, %286, %291 : vector<8x128xi1>, vector<8x128xf32>
    %cst_86 = arith.constant dense<0x7F800000> : vector<8xf32>
    %293 = vector.multi_reduction <minimumf>, %292, %cst_86 [1] : vector<8x128xf32> to vector<8xf32>
    %294 = vector.shape_cast %293 : vector<8xf32> to vector<8x1xf32>
    %295 = vector.broadcast %294 : vector<8x1xf32> to vector<8x128xf32>
    %296 = arith.cmpf oeq, %286, %295 : vector<8x128xf32>
    %cst_87 = arith.constant -1.000000e+30 : f32
    %297 = vector.broadcast %cst_87 : f32 to vector<8x128xf32>
    %298 = arith.select %296, %297, %284 : vector<8x128xi1>, vector<8x128xf32>
    %cst_88 = arith.constant dense<0xFF800000> : vector<8xf32>
    %299 = vector.multi_reduction <maximumf>, %298, %cst_88 [1] : vector<8x128xf32> to vector<8xf32>
    %300 = vector.shape_cast %299 : vector<8xf32> to vector<8x1xf32>
    %301 = vector.broadcast %300 : vector<8x1xf32> to vector<8x128xf32>
    %302 = arith.cmpf oeq, %298, %301 : vector<8x128xf32>
    %cst_89 = arith.constant 1.280000e+02 : f32
    %303 = vector.broadcast %cst_89 : f32 to vector<8x128xf32>
    %304 = arith.select %302, %286, %303 : vector<8x128xi1>, vector<8x128xf32>
    %cst_90 = arith.constant dense<0x7F800000> : vector<8xf32>
    %305 = vector.multi_reduction <minimumf>, %304, %cst_90 [1] : vector<8x128xf32> to vector<8xf32>
    %306 = vector.shape_cast %305 : vector<8xf32> to vector<8x1xf32>
    %307 = vector.broadcast %306 : vector<8x1xf32> to vector<8x128xf32>
    %308 = arith.cmpf oeq, %286, %307 : vector<8x128xf32>
    %309 = arith.ori %296, %308 : vector<8x128xi1>
    %cst_91 = arith.constant 0.000000e+00 : f32
    %310 = vector.broadcast %cst_91 : f32 to vector<8x128xf32>
    %311 = arith.select %309, %284, %310 : vector<8x128xi1>, vector<8x128xf32>
    %c0_92 = arith.constant 0 : index
    %c0_93 = arith.constant 0 : index
    %312 = vector.load %arg8[%c0_92, %c0_93] : memref<8x128xf32, #tpu.memory_space<vmem>>, vector<8x128xf32>
    tpu.vector_store %arg8[%c0_92, %c0_93], %311 {strides = array<i32>} : memref<8x128xf32, #tpu.memory_space<vmem>>, vector<8x128xf32>,
    return
  }
  func.func @transform_0(%arg0: i32) -> (i32, i32) {
    %c0_i32 = arith.constant 0 : i32
    %c0_i32_0 = arith.constant 0 : i32
    return %arg0, %c0_i32 : i32, i32
  }
  func.func @transform_1(%arg0: i32) -> (i32, i32) {
    %c0_i32 = arith.constant 0 : i32
    %c0_i32_0 = arith.constant 0 : i32
    %c0_i32_1 = arith.constant 0 : i32
    return %c0_i32, %c0_i32_0 : i32, i32
  }
  func.func @transform_2(%arg0: i32) -> (i32, i32) {
    %c0_i32 = arith.constant 0 : i32
    %c0_i32_0 = arith.constant 0 : i32
    %c0_i32_1 = arith.constant 0 : i32
    return %c0_i32, %c0_i32_0 : i32, i32
  }
  func.func @transform_3(%arg0: i32) -> (i32, i32) {
    %c0_i32 = arith.constant 0 : i32
    %c0_i32_0 = arith.constant 0 : i32
    %c0_i32_1 = arith.constant 0 : i32
    return %c0_i32, %c0_i32_0 : i32, i32
  }
  func.func @transform_4(%arg0: i32) -> (i32, i32) {
    %c0_i32 = arith.constant 0 : i32
    %c0_i32_0 = arith.constant 0 : i32
    %c0_i32_1 = arith.constant 0 : i32
    return %c0_i32, %c0_i32_0 : i32, i32
  }
  func.func @transform_5(%arg0: i32) -> (i32, i32) {
    %c0_i32 = arith.constant 0 : i32
    %c0_i32_0 = arith.constant 0 : i32
    %c0_i32_1 = arith.constant 0 : i32
    return %c0_i32, %c0_i32_0 : i32, i32
  }
  func.func @transform_6(%arg0: i32) -> (i32, i32) {
    %c0_i32 = arith.constant 0 : i32
    %c0_i32_0 = arith.constant 0 : i32
    %c0_i32_1 = arith.constant 0 : i32
    return %c0_i32, %c0_i32_0 : i32, i32
  }
  func.func @transform_7(%arg0: i32) -> (i32, i32) {
    %c0_i32 = arith.constant 0 : i32
    %c0_i32_0 = arith.constant 0 : i32
    return %arg0, %c0_i32 : i32, i32
  }
}

module attributes {stable_mosaic.version = 11 : i64} {
  func.func @_gating_kernel(%arg0: i32, %arg1: memref<8x32xf32, #tpu.memory_space<vmem>>, %arg2: memref<32x260xf32, #tpu.memory_space<vmem>>, %arg3: memref<1x260xf32, #tpu.memory_space<vmem>>, %arg4: memref<1x128xf32, #tpu.memory_space<vmem>>, %arg5: memref<128x4xf32, #tpu.memory_space<vmem>>, %arg6: memref<128x1xf32, #tpu.memory_space<vmem>>, %arg7: memref<1x1xf32, #tpu.memory_space<vmem>>, %arg8: memref<8x128xf32, #tpu.memory_space<vmem>>) attributes {dimension_semantics = [#tpu.dimension_semantics<parallel>], iteration_bounds = array<i64: 2>, scalar_prefetch = 0 : i64, scratch_operands = 0 : i64, tpu.core_type = #tpu.core_type<tc>, window_params = [{transform_indices = @transform_0, window_bounds = array<i64: 8, 32>}, {pipeline_mode = #tpu.pipeline_mode<synchronous>, transform_indices = @transform_1, window_bounds = array<i64: 32, 260>}, {pipeline_mode = #tpu.pipeline_mode<synchronous>, transform_indices = @transform_2, window_bounds = array<i64: 1, 260>}, {pipeline_mode = #tpu.pipeline_mode<synchronous>, transform_indices = @transform_3, window_bounds = array<i64: 1, 128>}, {pipeline_mode = #tpu.pipeline_mode<synchronous>, transform_indices = @transform_4, window_bounds = array<i64: 128, 4>}, {pipeline_mode = #tpu.pipeline_mode<synchronous>, transform_indices = @transform_5, window_bounds = array<i64: 128, 1>}, {pipeline_mode = #tpu.pipeline_mode<synchronous>, transform_indices = @transform_6, window_bounds = array<i64: 1, 1>}, {transform_indices = @transform_7, window_bounds = array<i64: 8, 128>}]} {
    %c0 = arith.constant 0 : index
    %c0_0 = arith.constant 0 : index
    %0 = vector.load %arg1[%c0, %c0_0] : memref<8x32xf32, #tpu.memory_space<vmem>>, vector<8x32xf32>
    %c0_1 = arith.constant 0 : index
    %c0_2 = arith.constant 0 : index
    %1 = vector.load %arg2[%c0_1, %c0_2] : memref<32x260xf32, #tpu.memory_space<vmem>>, vector<32x260xf32>
    %cst = arith.constant dense<0.000000e+00> : vector<8x260xf32>
    %2 = tpu.matmul %0, %1, %cst {dimension_numbers = #tpu.dot_dimension_numbers<[1], [0], [0], [1], [0, 0, 1, 1], [], []>} : vector<8x32xf32>, vector<32x260xf32>, vector<8x260xf32> -> vector<8x260xf32>
    %c0_3 = arith.constant 0 : index
    %c0_4 = arith.constant 0 : index
    %3 = vector.load %arg3[%c0_3, %c0_4] : memref<1x260xf32, #tpu.memory_space<vmem>>, vector<1x260xf32>
    %4 = vector.broadcast %3 : vector<1x260xf32> to vector<8x260xf32>
    %5 = arith.addf %2, %4 : vector<8x260xf32>
    %6 = vector.extract_strided_slice %5 {offsets = [0, 0], sizes = [8, 128], strides = [1, 1]} : vector<8x260xf32> to vector<8x128xf32>
    %c0_5 = arith.constant 0 : index
    %c0_6 = arith.constant 0 : index
    %7 = vector.load %arg4[%c0_5, %c0_6] : memref<1x128xf32, #tpu.memory_space<vmem>>, vector<1x128xf32>
    %8 = vector.broadcast %7 : vector<1x128xf32> to vector<8x128xf32>
    %9 = arith.mulf %6, %8 : vector<8x128xf32>
    %10 = vector.extract_strided_slice %5 {offsets = [0, 256], sizes = [8, 4], strides = [1, 1]} : vector<8x260xf32> to vector<8x4xf32>
    %11 = vector.extract_strided_slice %5 {offsets = [0, 128], sizes = [8, 128], strides = [1, 1]} : vector<8x260xf32> to vector<8x128xf32>
    %cst_7 = arith.constant 5.000000e-01 : f32
    %12 = vector.broadcast %cst_7 : f32 to vector<8x128xf32>
    %13 = arith.mulf %12, %11 : vector<8x128xf32>
    %cst_8 = arith.constant 4.471500e-02 : f32
    %14 = vector.broadcast %cst_8 : f32 to vector<8x128xf32>
    %15 = arith.mulf %14, %11 : vector<8x128xf32>
    %16 = arith.mulf %15, %11 : vector<8x128xf32>
    %17 = arith.mulf %16, %11 : vector<8x128xf32>
    %18 = arith.addf %11, %17 : vector<8x128xf32>
    %cst_9 = arith.constant 0.797884583 : f32
    %19 = vector.broadcast %cst_9 : f32 to vector<8x128xf32>
    %20 = arith.mulf %19, %18 : vector<8x128xf32>
    %21 = math.tanh %20 : vector<8x128xf32>
    %cst_10 = arith.constant 1.000000e+00 : f32
    %22 = vector.broadcast %cst_10 : f32 to vector<8x128xf32>
    %23 = arith.addf %22, %21 : vector<8x128xf32>
    %24 = arith.mulf %13, %23 : vector<8x128xf32>
    %c0_11 = arith.constant 0 : index
    %c0_12 = arith.constant 0 : index
    %25 = vector.load %arg6[%c0_11, %c0_12] : memref<128x1xf32, #tpu.memory_space<vmem>>, vector<128x1xf32>
    %cst_13 = arith.constant dense<0.000000e+00> : vector<8x1xf32>
    %26 = tpu.matmul %24, %25, %cst_13 {dimension_numbers = #tpu.dot_dimension_numbers<[1], [0], [0], [1], [0, 0, 1, 1], [], []>} : vector<8x128xf32>, vector<128x1xf32>, vector<8x1xf32> -> vector<8x1xf32>
    %c0_14 = arith.constant 0 : index
    %c0_15 = arith.constant 0 : index
    %27 = vector.load %arg7[%c0_14, %c0_15] : memref<1x1xf32, #tpu.memory_space<vmem>>, vector<1x1xf32>
    %28 = vector.broadcast %27 : vector<1x1xf32> to vector<8x1xf32>
    %29 = arith.addf %26, %28 : vector<8x1xf32>
    %cst_16 = arith.constant 0.000000e+00 : f32
    %30 = vector.broadcast %cst_16 : f32 to vector<8x1xf32>
    %31 = arith.subf %30, %29 : vector<8x1xf32>
    %32 = math.exp %31 : vector<8x1xf32>
    %cst_17 = arith.constant 1.000000e+00 : f32
    %33 = vector.broadcast %cst_17 : f32 to vector<8x1xf32>
    %34 = arith.addf %33, %32 : vector<8x1xf32>
    %cst_18 = arith.constant 1.000000e+00 : f32
    %35 = vector.broadcast %cst_18 : f32 to vector<8x1xf32>
    %36 = arith.divf %35, %34 : vector<8x1xf32>
    %cst_19 = arith.constant dense<0xFF800000> : vector<8xf32>
    %37 = vector.multi_reduction <maximumf>, %10, %cst_19 [1] : vector<8x4xf32> to vector<8xf32>
    %38 = vector.shape_cast %37 : vector<8xf32> to vector<8x1xf32>
    %39 = vector.broadcast %38 : vector<8x1xf32> to vector<8x4xf32>
    %40 = arith.subf %10, %39 : vector<8x4xf32>
    %41 = math.exp %40 : vector<8x4xf32>
    %cst_20 = arith.constant dense<0.000000e+00> : vector<8xf32>
    %42 = vector.multi_reduction <add>, %41, %cst_20 [1] : vector<8x4xf32> to vector<8xf32>
    %43 = vector.shape_cast %42 : vector<8xf32> to vector<8x1xf32>
    %44 = tpu.reciprocal %43 : vector<8x1xf32> -> vector<8x1xf32>
    %45 = vector.broadcast %44 : vector<8x1xf32> to vector<8x4xf32>
    %46 = arith.mulf %41, %45 : vector<8x4xf32>
    %47 = tpu.iota {dimensions = array<i32: 1>} : vector<8x4xi32>
    %48 = arith.sitofp %47 : vector<8x4xi32> to vector<8x4xf32>
    %cst_21 = arith.constant dense<0xFF800000> : vector<8xf32>
    %49 = vector.multi_reduction <maximumf>, %46, %cst_21 [1] : vector<8x4xf32> to vector<8xf32>
    %50 = vector.shape_cast %49 : vector<8xf32> to vector<8x1xf32>
    %51 = vector.broadcast %50 : vector<8x1xf32> to vector<8x4xf32>
    %52 = arith.cmpf oeq, %46, %51 : vector<8x4xf32>
    %cst_22 = arith.constant 4.000000e+00 : f32
    %53 = vector.broadcast %cst_22 : f32 to vector<8x4xf32>
    %54 = arith.select %52, %48, %53 : vector<8x4xi1>, vector<8x4xf32>
    %cst_23 = arith.constant dense<0x7F800000> : vector<8xf32>
    %55 = vector.multi_reduction <minimumf>, %54, %cst_23 [1] : vector<8x4xf32> to vector<8xf32>
    %56 = vector.shape_cast %55 : vector<8xf32> to vector<8x1xf32>
    %57 = vector.broadcast %56 : vector<8x1xf32> to vector<8x4xf32>
    %58 = arith.cmpf oeq, %48, %57 : vector<8x4xf32>
    %cst_24 = arith.constant -1.000000e+30 : f32
    %59 = vector.broadcast %cst_24 : f32 to vector<8x4xf32>
    %60 = arith.select %58, %59, %46 : vector<8x4xi1>, vector<8x4xf32>
    %cst_25 = arith.constant dense<0xFF800000> : vector<8xf32>
    %61 = vector.multi_reduction <maximumf>, %60, %cst_25 [1] : vector<8x4xf32> to vector<8xf32>
    %62 = vector.shape_cast %61 : vector<8xf32> to vector<8x1xf32>
    %63 = vector.broadcast %62 : vector<8x1xf32> to vector<8x4xf32>
    %64 = arith.cmpf oeq, %60, %63 : vector<8x4xf32>
    %cst_26 = arith.constant 4.000000e+00 : f32
    %65 = vector.broadcast %cst_26 : f32 to vector<8x4xf32>
    %66 = arith.select %64, %48, %65 : vector<8x4xi1>, vector<8x4xf32>
    %cst_27 = arith.constant dense<0x7F800000> : vector<8xf32>
    %67 = vector.multi_reduction <minimumf>, %66, %cst_27 [1] : vector<8x4xf32> to vector<8xf32>
    %68 = vector.shape_cast %67 : vector<8xf32> to vector<8x1xf32>
    %69 = vector.broadcast %68 : vector<8x1xf32> to vector<8x4xf32>
    %70 = arith.cmpf oeq, %48, %69 : vector<8x4xf32>
    %71 = arith.ori %58, %70 : vector<8x4xi1>
    %cst_28 = arith.constant 0.000000e+00 : f32
    %72 = vector.broadcast %cst_28 : f32 to vector<8x4xf32>
    %73 = arith.select %71, %46, %72 : vector<8x4xi1>, vector<8x4xf32>
    %74 = tpu.iota {dimensions = array<i32: 1>} : vector<8x128xi32>
    %c8_i32 = arith.constant 8 : i32
    %75 = vector.broadcast %c8_i32 : i32 to vector<8x128xi32>
    %76 = arith.cmpi slt, %74, %75 : vector<8x128xi32>
    %cst_29 = arith.constant -1.000000e+30 : f32
    %77 = vector.broadcast %cst_29 : f32 to vector<8x128xf32>
    %78 = arith.select %76, %9, %77 : vector<8x128xi1>, vector<8x128xf32>
    %cst_30 = arith.constant dense<0xFF800000> : vector<8xf32>
    %79 = vector.multi_reduction <maximumf>, %78, %cst_30 [1] : vector<8x128xf32> to vector<8xf32>
    %80 = vector.shape_cast %79 : vector<8xf32> to vector<8x1xf32>
    %81 = vector.broadcast %80 : vector<8x1xf32> to vector<8x128xf32>
    %82 = arith.subf %78, %81 : vector<8x128xf32>
    %83 = math.exp %82 : vector<8x128xf32>
    %c0_i32 = arith.constant 0 : i32
    %84 = vector.broadcast %c0_i32 : i32 to vector<8x128xi32>
    %85 = arith.cmpi sge, %74, %84 : vector<8x128xi32>
    %c2_i32 = arith.constant 2 : i32
    %86 = vector.broadcast %c2_i32 : i32 to vector<8x128xi32>
    %87 = arith.cmpi slt, %74, %86 : vector<8x128xi32>
    %88 = arith.andi %85, %87 : vector<8x128xi1>
    %c2_i32_31 = arith.constant 2 : i32
    %89 = vector.broadcast %c2_i32_31 : i32 to vector<8x128xi32>
    %90 = arith.cmpi sge, %74, %89 : vector<8x128xi32>
    %c4_i32 = arith.constant 4 : i32
    %91 = vector.broadcast %c4_i32 : i32 to vector<8x128xi32>
    %92 = arith.cmpi slt, %74, %91 : vector<8x128xi32>
    %93 = arith.andi %90, %92 : vector<8x128xi1>
    %c4_i32_32 = arith.constant 4 : i32
    %94 = vector.broadcast %c4_i32_32 : i32 to vector<8x128xi32>
    %95 = arith.cmpi sge, %74, %94 : vector<8x128xi32>
    %c6_i32 = arith.constant 6 : i32
    %96 = vector.broadcast %c6_i32 : i32 to vector<8x128xi32>
    %97 = arith.cmpi slt, %74, %96 : vector<8x128xi32>
    %98 = arith.andi %95, %97 : vector<8x128xi1>
    %c6_i32_33 = arith.constant 6 : i32
    %99 = vector.broadcast %c6_i32_33 : i32 to vector<8x128xi32>
    %100 = arith.cmpi sge, %74, %99 : vector<8x128xi32>
    %c8_i32_34 = arith.constant 8 : i32
    %101 = vector.broadcast %c8_i32_34 : i32 to vector<8x128xi32>
    %102 = arith.cmpi slt, %74, %101 : vector<8x128xi32>
    %103 = arith.andi %100, %102 : vector<8x128xi1>
    %c0_35 = arith.constant 0 : index
    %c0_36 = arith.constant 0 : index
    %104 = vector.load %arg5[%c0_35, %c0_36] : memref<128x4xf32, #tpu.memory_space<vmem>>, vector<128x4xf32>
    %cst_37 = arith.constant dense<0.000000e+00> : vector<8x4xf32>
    %105 = tpu.matmul %83, %104, %cst_37 {dimension_numbers = #tpu.dot_dimension_numbers<[1], [0], [0], [1], [0, 0, 1, 1], [], []>} : vector<8x128xf32>, vector<128x4xf32>, vector<8x4xf32> -> vector<8x4xf32>
    %106 = vector.extract_strided_slice %105 {offsets = [0, 0], sizes = [8, 1], strides = [1, 1]} : vector<8x4xf32> to vector<8x1xf32>
    %cst_38 = arith.constant 0.000000e+00 : f32
    %107 = vector.shape_cast %106 : vector<8x1xf32> to vector<8x1xf32>
    %108 = vector.broadcast %107 : vector<8x1xf32> to vector<8x128xf32>
    %109 = vector.broadcast %cst_38 : f32 to vector<8x128xf32>
    %110 = arith.select %88, %108, %109 : vector<8x128xi1>, vector<8x128xf32>
    %111 = vector.extract_strided_slice %105 {offsets = [0, 1], sizes = [8, 1], strides = [1, 1]} : vector<8x4xf32> to vector<8x1xf32>
    %cst_39 = arith.constant 0.000000e+00 : f32
    %112 = vector.shape_cast %111 : vector<8x1xf32> to vector<8x1xf32>
    %113 = vector.broadcast %112 : vector<8x1xf32> to vector<8x128xf32>
    %114 = vector.broadcast %cst_39 : f32 to vector<8x128xf32>
    %115 = arith.select %93, %113, %114 : vector<8x128xi1>, vector<8x128xf32>
    %116 = arith.addf %110, %115 : vector<8x128xf32>
    %117 = vector.extract_strided_slice %105 {offsets = [0, 2], sizes = [8, 1], strides = [1, 1]} : vector<8x4xf32> to vector<8x1xf32>
    %cst_40 = arith.constant 0.000000e+00 : f32
    %118 = vector.shape_cast %117 : vector<8x1xf32> to vector<8x1xf32>
    %119 = vector.broadcast %118 : vector<8x1xf32> to vector<8x128xf32>
    %120 = vector.broadcast %cst_40 : f32 to vector<8x128xf32>
    %121 = arith.select %98, %119, %120 : vector<8x128xi1>, vector<8x128xf32>
    %122 = arith.addf %116, %121 : vector<8x128xf32>
    %123 = vector.extract_strided_slice %105 {offsets = [0, 3], sizes = [8, 1], strides = [1, 1]} : vector<8x4xf32> to vector<8x1xf32>
    %cst_41 = arith.constant 0.000000e+00 : f32
    %124 = vector.shape_cast %123 : vector<8x1xf32> to vector<8x1xf32>
    %125 = vector.broadcast %124 : vector<8x1xf32> to vector<8x128xf32>
    %126 = vector.broadcast %cst_41 : f32 to vector<8x128xf32>
    %127 = arith.select %103, %125, %126 : vector<8x128xi1>, vector<8x128xf32>
    %128 = arith.addf %122, %127 : vector<8x128xf32>
    %cst_42 = arith.constant 1.000000e-30 : f32
    %129 = vector.broadcast %cst_42 : f32 to vector<8x128xf32>
    %130 = arith.addf %128, %129 : vector<8x128xf32>
    %131 = tpu.reciprocal %130 : vector<8x128xf32> -> vector<8x128xf32>
    %132 = arith.mulf %83, %131 : vector<8x128xf32>
    %133 = vector.broadcast %36 : vector<8x1xf32> to vector<8x128xf32>
    %134 = arith.mulf %132, %133 : vector<8x128xf32>
    %cst_43 = arith.constant 1.000000e+00 : f32
    %135 = vector.broadcast %cst_43 : f32 to vector<8x1xf32>
    %136 = arith.subf %135, %36 : vector<8x1xf32>
    %cst_44 = arith.constant 5.000000e-01 : f32
    %137 = vector.broadcast %cst_44 : f32 to vector<8x1xf32>
    %138 = arith.mulf %136, %137 : vector<8x1xf32>
    %139 = vector.broadcast %138 : vector<8x1xf32> to vector<8x128xf32>
    %140 = arith.addf %134, %139 : vector<8x128xf32>
    %cst_45 = arith.constant -1.000000e+30 : f32
    %141 = vector.broadcast %cst_45 : f32 to vector<8x128xf32>
    %142 = arith.select %88, %140, %141 : vector<8x128xi1>, vector<8x128xf32>
    %143 = tpu.iota {dimensions = array<i32: 1>} : vector<8x128xi32>
    %144 = arith.sitofp %143 : vector<8x128xi32> to vector<8x128xf32>
    %cst_46 = arith.constant dense<0xFF800000> : vector<8xf32>
    %145 = vector.multi_reduction <maximumf>, %142, %cst_46 [1] : vector<8x128xf32> to vector<8xf32>
    %146 = vector.shape_cast %145 : vector<8xf32> to vector<8x1xf32>
    %147 = vector.broadcast %146 : vector<8x1xf32> to vector<8x128xf32>
    %148 = arith.cmpf oeq, %142, %147 : vector<8x128xf32>
    %cst_47 = arith.constant 1.280000e+02 : f32
    %149 = vector.broadcast %cst_47 : f32 to vector<8x128xf32>
    %150 = arith.select %148, %144, %149 : vector<8x128xi1>, vector<8x128xf32>
    %cst_48 = arith.constant dense<0x7F800000> : vector<8xf32>
    %151 = vector.multi_reduction <minimumf>, %150, %cst_48 [1] : vector<8x128xf32> to vector<8xf32>
    %152 = vector.shape_cast %151 : vector<8xf32> to vector<8x1xf32>
    %153 = vector.broadcast %152 : vector<8x1xf32> to vector<8x128xf32>
    %154 = arith.cmpf oeq, %144, %153 : vector<8x128xf32>
    %cst_49 = arith.constant -1.000000e+30 : f32
    %155 = vector.broadcast %cst_49 : f32 to vector<8x128xf32>
    %156 = arith.select %154, %155, %142 : vector<8x128xi1>, vector<8x128xf32>
    %cst_50 = arith.constant dense<0xFF800000> : vector<8xf32>
    %157 = vector.multi_reduction <maximumf>, %156, %cst_50 [1] : vector<8x128xf32> to vector<8xf32>
    %158 = vector.shape_cast %157 : vector<8xf32> to vector<8x1xf32>
    %159 = vector.broadcast %158 : vector<8x1xf32> to vector<8x128xf32>
    %160 = arith.cmpf oeq, %156, %159 : vector<8x128xf32>
    %cst_51 = arith.constant 1.280000e+02 : f32
    %161 = vector.broadcast %cst_51 : f32 to vector<8x128xf32>
    %162 = arith.select %160, %144, %161 : vector<8x128xi1>, vector<8x128xf32>
    %cst_52 = arith.constant dense<0x7F800000> : vector<8xf32>
    %163 = vector.multi_reduction <minimumf>, %162, %cst_52 [1] : vector<8x128xf32> to vector<8xf32>
    %164 = vector.shape_cast %163 : vector<8xf32> to vector<8x1xf32>
    %165 = vector.broadcast %164 : vector<8x1xf32> to vector<8x128xf32>
    %166 = arith.cmpf oeq, %144, %165 : vector<8x128xf32>
    %167 = arith.ori %154, %166 : vector<8x128xi1>
    %168 = vector.extract_strided_slice %73 {offsets = [0, 0], sizes = [8, 1], strides = [1, 1]} : vector<8x4xf32> to vector<8x1xf32>
    %cst_53 = arith.constant 0.000000e+00 : f32
    %169 = vector.shape_cast %168 : vector<8x1xf32> to vector<8x1xf32>
    %170 = vector.broadcast %169 : vector<8x1xf32> to vector<8x128xf32>
    %171 = vector.broadcast %cst_53 : f32 to vector<8x128xf32>
    %172 = arith.select %88, %170, %171 : vector<8x128xi1>, vector<8x128xf32>
    %cst_54 = arith.constant -1.000000e+30 : f32
    %173 = vector.broadcast %cst_54 : f32 to vector<8x128xf32>
    %174 = arith.select %93, %140, %173 : vector<8x128xi1>, vector<8x128xf32>
    %175 = tpu.iota {dimensions = array<i32: 1>} : vector<8x128xi32>
    %176 = arith.sitofp %175 : vector<8x128xi32> to vector<8x128xf32>
    %cst_55 = arith.constant dense<0xFF800000> : vector<8xf32>
    %177 = vector.multi_reduction <maximumf>, %174, %cst_55 [1] : vector<8x128xf32> to vector<8xf32>
    %178 = vector.shape_cast %177 : vector<8xf32> to vector<8x1xf32>
    %179 = vector.broadcast %178 : vector<8x1xf32> to vector<8x128xf32>
    %180 = arith.cmpf oeq, %174, %179 : vector<8x128xf32>
    %cst_56 = arith.constant 1.280000e+02 : f32
    %181 = vector.broadcast %cst_56 : f32 to vector<8x128xf32>
    %182 = arith.select %180, %176, %181 : vector<8x128xi1>, vector<8x128xf32>
    %cst_57 = arith.constant dense<0x7F800000> : vector<8xf32>
    %183 = vector.multi_reduction <minimumf>, %182, %cst_57 [1] : vector<8x128xf32> to vector<8xf32>
    %184 = vector.shape_cast %183 : vector<8xf32> to vector<8x1xf32>
    %185 = vector.broadcast %184 : vector<8x1xf32> to vector<8x128xf32>
    %186 = arith.cmpf oeq, %176, %185 : vector<8x128xf32>
    %cst_58 = arith.constant -1.000000e+30 : f32
    %187 = vector.broadcast %cst_58 : f32 to vector<8x128xf32>
    %188 = arith.select %186, %187, %174 : vector<8x128xi1>, vector<8x128xf32>
    %cst_59 = arith.constant dense<0xFF800000> : vector<8xf32>
    %189 = vector.multi_reduction <maximumf>, %188, %cst_59 [1] : vector<8x128xf32> to vector<8xf32>
    %190 = vector.shape_cast %189 : vector<8xf32> to vector<8x1xf32>
    %191 = vector.broadcast %190 : vector<8x1xf32> to vector<8x128xf32>
    %192 = arith.cmpf oeq, %188, %191 : vector<8x128xf32>
    %cst_60 = arith.constant 1.280000e+02 : f32
    %193 = vector.broadcast %cst_60 : f32 to vector<8x128xf32>
    %194 = arith.select %192, %176, %193 : vector<8x128xi1>, vector<8x128xf32>
    %cst_61 = arith.constant dense<0x7F800000> : vector<8xf32>
    %195 = vector.multi_reduction <minimumf>, %194, %cst_61 [1] : vector<8x128xf32> to vector<8xf32>
    %196 = vector.shape_cast %195 : vector<8xf32> to vector<8x1xf32>
    %197 = vector.broadcast %196 : vector<8x1xf32> to vector<8x128xf32>
    %198 = arith.cmpf oeq, %176, %197 : vector<8x128xf32>
    %199 = arith.ori %186, %198 : vector<8x128xi1>
    %200 = arith.ori %167, %199 : vector<8x128xi1>
    %201 = vector.extract_strided_slice %73 {offsets = [0, 1], sizes = [8, 1], strides = [1, 1]} : vector<8x4xf32> to vector<8x1xf32>
    %cst_62 = arith.constant 0.000000e+00 : f32
    %202 = vector.shape_cast %201 : vector<8x1xf32> to vector<8x1xf32>
    %203 = vector.broadcast %202 : vector<8x1xf32> to vector<8x128xf32>
    %204 = vector.broadcast %cst_62 : f32 to vector<8x128xf32>
    %205 = arith.select %93, %203, %204 : vector<8x128xi1>, vector<8x128xf32>
    %206 = arith.addf %172, %205 : vector<8x128xf32>
    %cst_63 = arith.constant -1.000000e+30 : f32
    %207 = vector.broadcast %cst_63 : f32 to vector<8x128xf32>
    %208 = arith.select %98, %140, %207 : vector<8x128xi1>, vector<8x128xf32>
    %209 = tpu.iota {dimensions = array<i32: 1>} : vector<8x128xi32>
    %210 = arith.sitofp %209 : vector<8x128xi32> to vector<8x128xf32>
    %cst_64 = arith.constant dense<0xFF800000> : vector<8xf32>
    %211 = vector.multi_reduction <maximumf>, %208, %cst_64 [1] : vector<8x128xf32> to vector<8xf32>
    %212 = vector.shape_cast %211 : vector<8xf32> to vector<8x1xf32>
    %213 = vector.broadcast %212 : vector<8x1xf32> to vector<8x128xf32>
    %214 = arith.cmpf oeq, %208, %213 : vector<8x128xf32>
    %cst_65 = arith.constant 1.280000e+02 : f32
    %215 = vector.broadcast %cst_65 : f32 to vector<8x128xf32>
    %216 = arith.select %214, %210, %215 : vector<8x128xi1>, vector<8x128xf32>
    %cst_66 = arith.constant dense<0x7F800000> : vector<8xf32>
    %217 = vector.multi_reduction <minimumf>, %216, %cst_66 [1] : vector<8x128xf32> to vector<8xf32>
    %218 = vector.shape_cast %217 : vector<8xf32> to vector<8x1xf32>
    %219 = vector.broadcast %218 : vector<8x1xf32> to vector<8x128xf32>
    %220 = arith.cmpf oeq, %210, %219 : vector<8x128xf32>
    %cst_67 = arith.constant -1.000000e+30 : f32
    %221 = vector.broadcast %cst_67 : f32 to vector<8x128xf32>
    %222 = arith.select %220, %221, %208 : vector<8x128xi1>, vector<8x128xf32>
    %cst_68 = arith.constant dense<0xFF800000> : vector<8xf32>
    %223 = vector.multi_reduction <maximumf>, %222, %cst_68 [1] : vector<8x128xf32> to vector<8xf32>
    %224 = vector.shape_cast %223 : vector<8xf32> to vector<8x1xf32>
    %225 = vector.broadcast %224 : vector<8x1xf32> to vector<8x128xf32>
    %226 = arith.cmpf oeq, %222, %225 : vector<8x128xf32>
    %cst_69 = arith.constant 1.280000e+02 : f32
    %227 = vector.broadcast %cst_69 : f32 to vector<8x128xf32>
    %228 = arith.select %226, %210, %227 : vector<8x128xi1>, vector<8x128xf32>
    %cst_70 = arith.constant dense<0x7F800000> : vector<8xf32>
    %229 = vector.multi_reduction <minimumf>, %228, %cst_70 [1] : vector<8x128xf32> to vector<8xf32>
    %230 = vector.shape_cast %229 : vector<8xf32> to vector<8x1xf32>
    %231 = vector.broadcast %230 : vector<8x1xf32> to vector<8x128xf32>
    %232 = arith.cmpf oeq, %210, %231 : vector<8x128xf32>
    %233 = arith.ori %220, %232 : vector<8x128xi1>
    %234 = arith.ori %200, %233 : vector<8x128xi1>
    %235 = vector.extract_strided_slice %73 {offsets = [0, 2], sizes = [8, 1], strides = [1, 1]} : vector<8x4xf32> to vector<8x1xf32>
    %cst_71 = arith.constant 0.000000e+00 : f32
    %236 = vector.shape_cast %235 : vector<8x1xf32> to vector<8x1xf32>
    %237 = vector.broadcast %236 : vector<8x1xf32> to vector<8x128xf32>
    %238 = vector.broadcast %cst_71 : f32 to vector<8x128xf32>
    %239 = arith.select %98, %237, %238 : vector<8x128xi1>, vector<8x128xf32>
    %240 = arith.addf %206, %239 : vector<8x128xf32>
    %cst_72 = arith.constant -1.000000e+30 : f32
    %241 = vector.broadcast %cst_72 : f32 to vector<8x128xf32>
    %242 = arith.select %103, %140, %241 : vector<8x128xi1>, vector<8x128xf32>
    %243 = tpu.iota {dimensions = array<i32: 1>} : vector<8x128xi32>
    %244 = arith.sitofp %243 : vector<8x128xi32> to vector<8x128xf32>
    %cst_73 = arith.constant dense<0xFF800000> : vector<8xf32>
    %245 = vector.multi_reduction <maximumf>, %242, %cst_73 [1] : vector<8x128xf32> to vector<8xf32>
    %246 = vector.shape_cast %245 : vector<8xf32> to vector<8x1xf32>
    %247 = vector.broadcast %246 : vector<8x1xf32> to vector<8x128xf32>
    %248 = arith.cmpf oeq, %242, %247 : vector<8x128xf32>
    %cst_74 = arith.constant 1.280000e+02 : f32
    %249 = vector.broadcast %cst_74 : f32 to vector<8x128xf32>
    %250 = arith.select %248, %244, %249 : vector<8x128xi1>, vector<8x128xf32>
    %cst_75 = arith.constant dense<0x7F800000> : vector<8xf32>
    %251 = vector.multi_reduction <minimumf>, %250, %cst_75 [1] : vector<8x128xf32> to vector<8xf32>
    %252 = vector.shape_cast %251 : vector<8xf32> to vector<8x1xf32>
    %253 = vector.broadcast %252 : vector<8x1xf32> to vector<8x128xf32>
    %254 = arith.cmpf oeq, %244, %253 : vector<8x128xf32>
    %cst_76 = arith.constant -1.000000e+30 : f32
    %255 = vector.broadcast %cst_76 : f32 to vector<8x128xf32>
    %256 = arith.select %254, %255, %242 : vector<8x128xi1>, vector<8x128xf32>
    %cst_77 = arith.constant dense<0xFF800000> : vector<8xf32>
    %257 = vector.multi_reduction <maximumf>, %256, %cst_77 [1] : vector<8x128xf32> to vector<8xf32>
    %258 = vector.shape_cast %257 : vector<8xf32> to vector<8x1xf32>
    %259 = vector.broadcast %258 : vector<8x1xf32> to vector<8x128xf32>
    %260 = arith.cmpf oeq, %256, %259 : vector<8x128xf32>
    %cst_78 = arith.constant 1.280000e+02 : f32
    %261 = vector.broadcast %cst_78 : f32 to vector<8x128xf32>
    %262 = arith.select %260, %244, %261 : vector<8x128xi1>, vector<8x128xf32>
    %cst_79 = arith.constant dense<0x7F800000> : vector<8xf32>
    %263 = vector.multi_reduction <minimumf>, %262, %cst_79 [1] : vector<8x128xf32> to vector<8xf32>
    %264 = vector.shape_cast %263 : vector<8xf32> to vector<8x1xf32>
    %265 = vector.broadcast %264 : vector<8x1xf32> to vector<8x128xf32>
    %266 = arith.cmpf oeq, %244, %265 : vector<8x128xf32>
    %267 = arith.ori %254, %266 : vector<8x128xi1>
    %268 = arith.ori %234, %267 : vector<8x128xi1>
    %269 = vector.extract_strided_slice %73 {offsets = [0, 3], sizes = [8, 1], strides = [1, 1]} : vector<8x4xf32> to vector<8x1xf32>
    %cst_80 = arith.constant 0.000000e+00 : f32
    %270 = vector.shape_cast %269 : vector<8x1xf32> to vector<8x1xf32>
    %271 = vector.broadcast %270 : vector<8x1xf32> to vector<8x128xf32>
    %272 = vector.broadcast %cst_80 : f32 to vector<8x128xf32>
    %273 = arith.select %103, %271, %272 : vector<8x128xi1>, vector<8x128xf32>
    %274 = arith.addf %240, %273 : vector<8x128xf32>
    %cst_81 = arith.constant 0.000000e+00 : f32
    %275 = vector.broadcast %cst_81 : f32 to vector<8x128xf32>
    %276 = arith.select %268, %140, %275 : vector<8x128xi1>, vector<8x128xf32>
    %277 = arith.mulf %276, %274 : vector<8x128xf32>
    %cst_82 = arith.constant dense<0.000000e+00> : vector<8xf32>
    %278 = vector.multi_reduction <add>, %277, %cst_82 [1] : vector<8x128xf32> to vector<8xf32>
    %279 = vector.shape_cast %278 : vector<8xf32> to vector<8x1xf32>
    %cst_83 = arith.constant 9.99999971E-10 : f32
    %280 = vector.broadcast %cst_83 : f32 to vector<8x1xf32>
    %281 = arith.addf %279, %280 : vector<8x1xf32>
    %282 = tpu.reciprocal %281 : vector<8x1xf32> -> vector<8x1xf32>
    %283 = vector.broadcast %282 : vector<8x1xf32> to vector<8x128xf32>
    %284 = arith.mulf %277, %283 : vector<8x128xf32>
    %285 = tpu.iota {dimensions = array<i32: 1>} : vector<8x128xi32>
    %286 = arith.sitofp %285 : vector<8x128xi32> to vector<8x128xf32>
    %cst_84 = arith.constant dense<0xFF800000> : vector<8xf32>
    %287 = vector.multi_reduction <maximumf>, %284, %cst_84 [1] : vector<8x128xf32> to vector<8xf32>
    %288 = vector.shape_cast %287 : vector<8xf32> to vector<8x1xf32>
    %289 = vector.broadcast %288 : vector<8x1xf32> to vector<8x128xf32>
    %290 = arith.cmpf oeq, %284, %289 : vector<8x128xf32>
    %cst_85 = arith.constant 1.280000e+02 : f32
    %291 = vector.broadcast %cst_85 : f32 to vector<8x128xf32>
    %292 = arith.select %290, %286, %291 : vector<8x128xi1>, vector<8x128xf32>
    %cst_86 = arith.constant dense<0x7F800000> : vector<8xf32>
    %293 = vector.multi_reduction <minimumf>, %292, %cst_86 [1] : vector<8x128xf32> to vector<8xf32>
    %294 = vector.shape_cast %293 : vector<8xf32> to vector<8x1xf32>
    %295 = vector.broadcast %294 : vector<8x1xf32> to vector<8x128xf32>
    %296 = arith.cmpf oeq, %286, %295 : vector<8x128xf32>
    %cst_87 = arith.constant -1.000000e+30 : f32
    %297 = vector.broadcast %cst_87 : f32 to vector<8x128xf32>
    %298 = arith.select %296, %297, %284 : vector<8x128xi1>, vector<8x128xf32>
    %cst_88 = arith.constant dense<0xFF800000> : vector<8xf32>
    %299 = vector.multi_reduction <maximumf>, %298, %cst_88 [1] : vector<8x128xf32> to vector<8xf32>
    %300 = vector.shape_cast %299 : vector<8xf32> to vector<8x1xf32>
    %301 = vector.broadcast %300 : vector<8x1xf32> to vector<8x128xf32>
    %302 = arith.cmpf oeq, %298, %301 : vector<8x128xf32>
    %cst_89 = arith.constant 1.280000e+02 : f32
    %303 = vector.broadcast %cst_89 : f32 to vector<8x128xf32>
    %304 = arith.select %302, %286, %303 : vector<8x128xi1>, vector<8x128xf32>
    %cst_90 = arith.constant dense<0x7F800000> : vector<8xf32>
    %305 = vector.multi_reduction <minimumf>, %304, %cst_90 [1] : vector<8x128xf32> to vector<8xf32>
    %306 = vector.shape_cast %305 : vector<8xf32> to vector<8x1xf32>
    %307 = vector.broadcast %306 : vector<8x1xf32> to vector<8x128xf32>
    %308 = arith.cmpf oeq, %286, %307 : vector<8x128xf32>
    %309 = arith.ori %296, %308 : vector<8x128xi1>
    %cst_91 = arith.constant 0.000000e+00 : f32
    %310 = vector.broadcast %cst_91 : f32 to vector<8x128xf32>
    %311 = arith.select %309, %284, %310 : vector<8x128xi1>, vector<8x128xf32>
    %c0_92 = arith.constant 0 : index
    %c0_93 = arith.constant 0 : index
    %312 = vector.load %arg8[%c0_92, %c0_93] : memref<8x128xf32, #tpu.memory_space<vmem>>, vector<8x128xf32>
    tpu.vector_store %arg8[%c0_92, %c0_93], %311 {strides = array<i32>} : memref<8x128xf32, #tpu.memory_space<vmem>>, vector<8x128xf32>,
    return
  }
  func.func @transform_0(%arg0: i32) -> (i32, i32) {
    %c0_i32 = arith.constant 0 : i32
    %c0_i32_0 = arith.constant 0 : i32
    return %arg0, %c0_i32 : i32, i32
  }
  func.func @transform_1(%arg0: i32) -> (i32, i32) {
    %c0_i32 = arith.constant 0 : i32
    %c0_i32_0 = arith.constant 0 : i32
    %c0_i32_1 = arith.constant 0 : i32
    return %c0_i32, %c0_i32_0 : i32, i32
  }
  func.func @transform_2(%arg0: i32) -> (i32, i32) {
    %c0_i32 = arith.constant 0 : i32
    %c0_i32_0 = arith.constant 0 : i32
    %c0_i32_1 = arith.constant 0 : i32
    return %c0_i32, %c0_i32_0 : i32, i32
  }
  func.func @transform_3(%arg0: i32) -> (i32, i32) {
    %c0_i32 = arith.constant 0 : i32
    %c0_i32_0 = arith.constant 0 : i32
    %c0_i32_1 = arith.constant 0 : i32
    return %c0_i32, %c0_i32_0 : i32, i32
  }
  func.func @transform_4(%arg0: i32) -> (i32, i32) {
    %c0_i32 = arith.constant 0 : i32
    %c0_i32_0 = arith.constant 0 : i32
    %c0_i32_1 = arith.constant 0 : i32
    return %c0_i32, %c0_i32_0 : i32, i32
  }
  func.func @transform_5(%arg0: i32) -> (i32, i32) {
    %c0_i32 = arith.constant 0 : i32
    %c0_i32_0 = arith.constant 0 : i32
    %c0_i32_1 = arith.constant 0 : i32
    return %c0_i32, %c0_i32_0 : i32, i32
  }
  func.func @transform_6(%arg0: i32) -> (i32, i32) {
    %c0_i32 = arith.constant 0 : i32
    %c0_i32_0 = arith.constant 0 : i32
    %c0_i32_1 = arith.constant 0 : i32
    return %c0_i32, %c0_i32_0 : i32, i32
  }
  func.func @transform_7(%arg0: i32) -> (i32, i32) {
    %c0_i32 = arith.constant 0 : i32
    %c0_i32_0 = arith.constant 0 : i32
    return %arg0, %c0_i32 : i32, i32
  }
}

</mosaic_0001>

<bundles_post_ra>
// kernel: tpu_custom_call.1
= control target key start
LH: loop header
LB: loop body
LE: loop exit
PB: predicated region body
PF: predicated region fallthrough
CT: control target
= control target key end

     0   :  { %s1706_s0 = inlined_call_operand.vmem [shape: f32[16,32], index: 0, kind: input, shape index: {}]   ;;  %s1707_s1 = inlined_call_operand.vmem [shape: f32[32,260], index: 1, kind: input, shape index: {}]   ;;  %s1708_s2 = inlined_call_operand.vmem [shape: f32[1,260], index: 2, kind: input, shape index: {}]   ;;  %s1709_s3 = inlined_call_operand.vmem [shape: f32[1,128], index: 3, kind: input, shape index: {}]   ;;  %s1710_s4 = inlined_call_operand.vmem [shape: f32[128,4], index: 4, kind: input, shape index: {}]   ;;  %s1711_s5 = inlined_call_operand.vmem [shape: f32[128,1], index: 5, kind: input, shape index: {}]   ;;  %s1712_s6 = inlined_call_operand.<no memory space> [shape: f32[1,1], index: 6, kind: input, shape index: {}]   ;;  %s1713_s7 = inlined_call_operand.hbm [shape: f32[16,128], index: 7, kind: output, shape index: {}]  }
   0x1   :  { %v12_v0 = vstv %s1712_s6 }
   0x2   :  { %13 = vst [vmem:[#allocation2] sm:$0x1] %v12_v0 }
   0x3   :  { %14 = vsyncpa [#allocation4], 0 }
   0x4   :  { %16 = vsyncpa [#allocation4 + $0x1], 0  ;;  %s1322_s26 = smov 0   ;;  %s1324_s27 = smov 0  }
   0x5   :  { %s1326_s28 = smov 0   ;;  %s1328_s29 = smov 0  }
   0x6 LB: > { %s1343_s6 = sadd.s32 4294967295, %s1269_s29   ;;  %s941_s30 = sadd.s32 4294967294, %s1269_s29   ;;  %s1269_s29 = sphi %s1328_s29, %s1725_s29   ;;  %s1265_s28 = sphi %s1326_s28, %s1724_s28   ;;  %s1261_s27 = sphi %s1324_s27, %s1723_s27   ;;  %s1257_s26 = sphi %s1322_s26, %s1722_s26  }
   0x7   : > { %s1347_s8 = sadd.s32 1, %s1269_s29   ;;  %s181_s9 = sadd.s32 1, %s1265_s28 }
   0x8   : > { %s178_s10 = ssub.s32 %s1269_s29, %s1347_s8  ;;  %p191_p0 = scmp.ne.s32.totalorder %s1265_s28, %s1261_s27 }
   0x9   : > { %p179_p1 = scmp.eq.s32.totalorder %s178_s10, 0  ;;  %p192_p2 = scmp.eq.s32.totalorder %s1343_s6, 1 }
   0xa   : > { %p197_p3 = scmp.ne.s32.totalorder %s1261_s27, %s1257_s26  ;;  %p198_p4 = scmp.eq.s32.totalorder %s941_s30, 1 }
   0xb   : > { %s1358_s11 = scalar_select %p179_p1, %s1265_s28, %s181_s9  }
   0xc   : > { %p1360_p5 = por %p192_p2, %p191_p0  ;;  %p1364_p6 = por %p198_p4, %p197_p3 }
   0xd   : > { %p944_p7 = scmp.ge.s32.totalorder %s1269_s29, 1  ;;  %p241_p8 = scmp.lt.s32.totalorder %s1269_s29, 3 }
   0xf   : > { %p242_p9 = pnand %p944_p7, %p241_p8 }
  0x10   : > { %v278_v1 = vld [vmem:[%s1707_s1 + $0x8] sm:$0xff] (!%p242_p9)  ;;  %v281_v2 = vld [vmem:[%s1707_s1 + $0x20] sm:$0xff] (!%p242_p9)  ;;  %p272_p10 = scmp.lt.s32.totalorder (!%p242_p9), %s1343_s6, 1  ;;  %v280_v5 = vld [vmem:[%s1707_s1 + $0x18] sm:$0xff] (!%p242_p9)  ;;  %v1271_v8 = vmov (!%p242_p9), 0.0|0.0   ;;  %v1272_v9 = vmov (!%p242_p9), 0.0   ;;  %v291_v58 = vlaneseq (!%p242_p9) }
  0x11   : > { %245 = sbr.rel (%p242_p9) target bundleno = 2182 (0x886), region = 48  ;;  %v277_v3 = vld [vmem:[%s1707_s1] sm:$0xff] (!%p242_p9)  ;;  %v1075_v4 = vpack.c.bf16 (!%p242_p9), %v281_v2, %v278_v1  ;;  %v284_v6 = vld [vmem:[%s1707_s1 + $0x38] sm:$0xff] (!%p242_p9)  ;;  %v287_v7 = vld [vmem:[%s1707_s1 + $0x50] sm:$0xff] (!%p242_p9)  ;;  %1083 = vmatprep.subr.bf16.mxu1 (!%p242_p9), %v1271_v8  ;;  %374 = vmatprep.mubr.f32.mxu0 (!%p242_p9), %v1272_v9  ;;  %vm1273_vm0 = vmmov (!%p242_p9), 0   ;;  %vm306_vm1 = vcmask (!%p242_p9), 261120  }
  0x12   : > { %v1077_v10 = vpack.c.bf16 (!%p242_p9), %v280_v5, %v277_v3  ;;  %v1079_v11 = vpack.c.bf16 (!%p242_p9), %v287_v7, %v284_v6  ;;  %v283_v12 = vld [vmem:[%s1707_s1 + $0x30] sm:$0xff] (!%p242_p9)  ;;  %v286_v13 = vld [vmem:[%s1707_s1 + $0x48] sm:$0xff] (!%p242_p9)  ;;  %1002 = vmatprep.mubr.msk.f32.mxu1 (!%p242_p9), %vm1273_vm0, %v1272_v9  ;;  %v285_v16 = vld [vmem:[%s1707_s1 + $0x40] sm:$0xff] (!%p242_p9)  ;;  %v292_v59 = vshrl.u32 (!%p242_p9), %v291_v58, 7  ;;  %v1506_v1 = vand.u32 (!%p242_p9), 127, %v291_v58  ;;  %s269_s21 = sand.u32 (!%p242_p9), 1, %s1261_s27  }
  0x13   : > { %v279_v14 = vld [vmem:[%s1707_s1 + $0x10] sm:$0xff] (!%p242_p9)  ;;  %1076 = vmatprep.subr.bf16.mxu0 (!%p242_p9), %v1075_v4  ;;  %v282_v15 = vld [vmem:[%s1707_s1 + $0x28] sm:$0xff] (!%p242_p9)  ;;  %v288_v17 = vld [vmem:[%s1707_s1 + $0x58] sm:$0xff] (!%p242_p9)  ;;  %v1081_v18 = vpack.c.bf16 (!%p242_p9), %v286_v13, %v283_v12  ;;  %vm567_vm3 = vcmask (!%p242_p9), 31744   ;;  %s945_s22 = sshll.u32 (!%p242_p9), %s269_s21, 3  ;;  %s952_s23 = sshll.u32 (!%p242_p9), %s1343_s6, 7 }
  0x14   : > { %1078 = vmatpush1.bf16.msra.mxu0 (!%p242_p9), %v1077_v10  ;;  %v1084_v19 = vpack.c.bf16 (!%p242_p9), %v282_v15, %v279_v14  ;;  %v468_v20 = vld [vmem:[%s1711_s5] sm:$0xff] (!%p242_p9)  ;;  %v469_v21 = vld [vmem:[%s1711_s5 + $0x8] sm:$0xff] (!%p242_p9)  ;;  %v1087_v22 = vpack.c.bf16 (!%p242_p9), %v288_v17, %v285_v16  ;;  %v470_v25 = vld [vmem:[%s1711_s5 + $0x10] sm:$0xff] (!%p242_p9)  ;;  %v293_v60 = vsub.s32 (!%p242_p9), 0, %v292_v59  ;;  %v297_v62 = vsub.s32 (!%p242_p9), 1, %v292_v59  ;;  %s1664_s10 = scalar_lea.hbm (!%p242_p9), %s1713_s7, %s952_s23  ;;  %s869_s14 = scalar_lea.sflag (!%p242_p9), [#allocation4], %s269_s21 }
  0x15   : > { %1080 = vmatprep.subr.bf16.mxu0 (!%p242_p9), %v1079_v11  ;;  %v1090_v24 = vpack.c.bf16 (!%p242_p9), %v469_v21, %v468_v20  ;;  %v471_v26 = vld [vmem:[%s1711_s5 + $0x18] sm:$0xff] (!%p242_p9)  ;;  %v472_v28 = vld [vmem:[%s1711_s5 + $0x20] sm:$0xff] (!%p242_p9)  ;;  %v473_v29 = vld [vmem:[%s1711_s5 + $0x28] sm:$0xff] (!%p242_p9)  ;;  %v301_v63 = vsub.s32 (!%p242_p9), 2, %v292_v59  ;;  %vm603_vm2 = vcmp.lt.s32.totalorder (!%p242_p9), %v1506_v1, 8  ;;  %v1276_v59 = vmov (!%p242_p9), 2  }
  0x16   : > { %1085 = vmatpush3.bf16.msra.mxu1 (!%p242_p9), %v1084_v19  ;;  %v1093_v27 = vpack.c.bf16 (!%p242_p9), %v471_v26, %v470_v25  ;;  %v1096_v30 = vpack.c.bf16 (!%p242_p9), %v473_v29, %v472_v28  ;;  %v474_v31 = vld [vmem:[%s1711_s5 + $0x30] sm:$0xff] (!%p242_p9)  ;;  %v475_v32 = vld [vmem:[%s1711_s5 + $0x38] sm:$0xff] (!%p242_p9)  ;;  %v476_v34 = vld [vmem:[%s1711_s5 + $0x40] sm:$0xff] (!%p242_p9)  ;;  %vm613_vm4 = vcmp.ge.s32.totalorder (!%p242_p9), %v1506_v1, 2  ;;  %vm614_vm5 = vcmp.lt.s32.totalorder (!%p242_p9), %v1506_v1, 4  ;;  %s1278_s15 = smov (!%p242_p9), [#allocation3]  }
  0x17   : > { %1086 = vmatprep.subr.bf16.mxu1 (!%p242_p9), %v1271_v8  ;;  %v1099_v33 = vpack.c.bf16 (!%p242_p9), %v475_v32, %v474_v31  ;;  %v477_v35 = vld [vmem:[%s1711_s5 + $0x48] sm:$0xff] (!%p242_p9)  ;;  %v478_v37 = vld [vmem:[%s1711_s5 + $0x50] sm:$0xff] (!%p242_p9)  ;;  %v479_v38 = vld [vmem:[%s1711_s5 + $0x58] sm:$0xff] (!%p242_p9)  ;;  %vm616_vm6 = vcmp.ge.s32.totalorder (!%p242_p9), %v1506_v1, 4  ;;  %vm617_vm7 = vcmp.lt.s32.totalorder (!%p242_p9), %v1506_v1, 6  ;;  %vm611_vm8 = vcmp.lt.s32.totalorder (!%p242_p9), %v1506_v1, 2 }
  0x18   : > { %s273_s17 = scalar_select %p272_p10, %s1343_s6, 1  ;;  %1082 = vmatpush1.bf16.msra.mxu0 %v1081_v18  ;;  %v1102_v36 = vpack.c.bf16 %v477_v35, %v476_v34  ;;  %v1105_v39 = vpack.c.bf16 %v479_v38, %v478_v37  ;;  %v480_v40 = vld [vmem:[%s1711_s5 + $0x60] sm:$0xff]  ;;  %v481_v41 = vld [vmem:[%s1711_s5 + $0x68] sm:$0xff]  ;;  %v482_v43 = vld [vmem:[%s1711_s5 + $0x70] sm:$0xff]  ;;  %vm619_vm11 = vcmp.ge.s32.totalorder %v1506_v1, 6 }
  0x19   : > { %1089 = vmatprep.subr.bf16.mxu0 %v1271_v8  ;;  %v1108_v42 = vpack.c.bf16 %v481_v41, %v480_v40  ;;  %v483_v44 = vld [vmem:[%s1711_s5 + $0x78] sm:$0xff]  ;;  %v621_v46 = vld [vmem:[%s1710_s4] sm:$0xff]  ;;  %v622_v47 = vld [vmem:[%s1710_s4 + $0x8] sm:$0xff]  ;;  %s1211_s16 = sshll.u32 %s1278_s15, 4  ;;  %s1212_s16 = int_to_ptr.vmem [resolvable:$false] %s1211_s16 }
  0x1a   : > { %s946_s24 = sshll.u32 %s273_s17, 3  ;;  %1088 = vmatpush3.bf16.msra.mxu1 %v1087_v22  ;;  %v1111_v45 = vpack.c.bf16 %v483_v44, %v482_v43  ;;  %v623_v48 = vld [vmem:[%s1710_s4 + $0x10] sm:$0xff]  ;;  %v1114_v49 = vpack.c.bf16 %v622_v47, %v621_v46  ;;  %v624_v50 = vld [vmem:[%s1710_s4 + $0x18] sm:$0xff]  ;;  %v625_v52 = vld [vmem:[%s1710_s4 + $0x20] sm:$0xff]  ;;  %v1274_v46 = vmov 1   ;;  %s1213_s17 = scalar_lea.vmem %s1212_s16, 256 }
  0x1b   : > { %s275_s9 = scalar_lea.vmem %s1706_s0, %s946_s24  ;;  %1113 = vmatprep.subr.bf16.mxu1 %v1271_v8  ;;  %v1117_v51 = vpack.c.bf16 %v624_v50, %v623_v48  ;;  %v626_v53 = vld [vmem:[%s1710_s4 + $0x28] sm:$0xff]  ;;  %v627_v55 = vld [vmem:[%s1710_s4 + $0x30] sm:$0xff]  ;;  %v628_v56 = vld [vmem:[%s1710_s4 + $0x38] sm:$0xff]  ;;  %1184 = vset.pattern.permute.xlu0 %v1274_v46  ;;  %s271_s24 = scalar_lea.vmem [#allocation3], %s945_s22 }
  0x1c   : > { %v276_v23 = vld [vmem:[%s275_s9] sm:$0xff]  ;;  %v1120_v54 = vpack.c.bf16 %v626_v53, %v625_v52  ;;  %v1123_v57 = vpack.c.bf16 %v628_v56, %v627_v55  ;;  %v630_v22 = vld [vmem:[%s1710_s4 + $0x48] sm:$0xff]  ;;  %v632_v25 = vld [vmem:[%s1710_s4 + $0x58] sm:$0xff]  ;;  %s882_s25 = sshll.u32 %s271_s24, 4  ;;  %s1666_s25 = int_to_ptr.vmem [resolvable:$true] %s882_s25 }
  0x1d   : > { %947 = vmatmul.mubr.msk.f32.vlgmr.msra.gmra.mrb[0].mxu0 %vm306_vm1, %v276_v23  ;;  %1003 = vmatmul.mubr.msk.f32.vlgmr.msra.gmra.mrb[0].mxu1 %vm306_vm1, %v276_v23  ;;  %v289_v61 = vld [vmem:[%s1708_s2] sm:$0x7]  ;;  %v634_v31 = vld [vmem:[%s1710_s4 + $0x68] sm:$0xff]  ;;  %v635_v34 = vld [vmem:[%s1710_s4 + $0x70] sm:$0xff]  ;;  %s1207_s6 = scalar_lea.vmem %s1666_s25, 128  ;;  %p1214_p0 = scmp.lt.s32.totalorder %s1666_s25, %s1212_s16 }
  0x1e   : > { %1091 = vmatpush3.bf16.msra.mxu0 %v1090_v24  ;;  %1037 = vmatprep.mubr.msk.f32.mxu0 %vm1273_vm0, %v1272_v9  ;;  %v294_v0 = vrot.slane %v289_v61, %v293_v60  ;;  %v298_v2 = vrot.slane %v289_v61, %v297_v62  ;;  %v302_v3 = vrot.slane %v289_v61, %v301_v63  ;;  %v949_v5 = vld [vmem:[%s1709_s3] ss:$0 sm:$0xff]  ;;  %v631_v24 = vld [vmem:[%s1710_s4 + $0x50] sm:$0xff]  ;;  %v636_v35 = vld [vmem:[%s1710_s4 + $0x78] sm:$0xff]  ;;  %v1277_v61 = vmov 3   ;;  %p1208_p11 = scmp.ne.s32.totalorder %s1666_s25, %s1207_s6  ;;  %p1215_p1 = scmp.lt.s32.totalorder %s1213_s17, %s1207_s6 }
  0x1f   : > { %1092 = vmatprep.subr.bf16.mxu0 %v1271_v8  ;;  %1072 = vmatprep.mubr.msk.f32.mxu1 %vm1273_vm0, %v1272_v9  ;;  %v629_v21 = vld [vmem:[%s1710_s4 + $0x40] sm:$0xff]  ;;  %v1129_v26 = vpack.c.bf16 %v632_v25, %v631_v24  ;;  %vm1557_vm9 = vmand %vm613_vm4, %vm614_vm5 }
  0x20   : > { %1115 = vmatpush3.bf16.msra.mxu1 %v1114_v49  ;;  %v1126_v23 = vpack.c.bf16 %v630_v22, %v629_v21  ;;  %v950_v49 = vld [vmem:[#allocation2] ss:$0 sm:$0xff]  ;;  %vm1561_vm10 = vmand %vm616_vm6, %vm617_vm7  ;;  %p1209_p12 = pnand %p1208_p11, %p1360_p5  ;;  %p1216_p2 = por %p1215_p1, %p1214_p0 }
  0x21   : > { %1116 = vmatprep.subr.bf16.mxu1 %v1271_v8  ;;  %vm1574_vm12 = vmand %vm619_vm11, %vm603_vm2 }
  0x22   : > { %1094 = vmatpush3.bf16.msra.mxu0 %v1093_v27  ;;  %p1210_p13 = pneg %p1209_p12 }
  0x23   : > { %1095 = vmatprep.subr.bf16.mxu0 %v1271_v8 }
  0x24   : > { %1118 = vmatpush3.bf16.msra.mxu1 %v1117_v51  ;;  %p1217_p3 = pnand %p1216_p2, %p1210_p13 }
  0x25   : > { %1119 = vmatprep.subr.bf16.mxu1 %v1271_v8 }
  0x26   : > { %1097 = vmatpush3.bf16.msra.mxu0 %v1096_v30  ;;  %v633_v30 = vld [vmem:[%s1710_s4 + $0x60] sm:$0xff] }
  0x27   : > { %1098 = vmatprep.subr.bf16.mxu0 %v1271_v8  ;;  %v1132_v32 = vpack.c.bf16 %v634_v31, %v633_v30 }
  0x28   : > { %1121 = vmatpush3.bf16.msra.mxu1 %v1120_v54 }
  0x29   : > { %1122 = vmatprep.subr.bf16.mxu1 %v1271_v8 }
  0x2a   : > { %1100 = vmatpush3.bf16.msra.mxu0 %v1099_v33 }
  0x2b   : > { %1101 = vmatprep.subr.bf16.mxu0 %v1271_v8 }
  0x2c   : > { %1124 = vmatpush3.bf16.msra.mxu1 %v1123_v57 }
  0x2d   : > { %1125 = vmatprep.subr.bf16.mxu1 %v1271_v8 }
  0x2e   : > { %1103 = vmatpush3.bf16.msra.mxu0 %v1102_v36  ;;  %v1135_v36 = vpack.c.bf16 %v636_v35, %v635_v34 }
  0x2f   : > { %1104 = vmatprep.subr.bf16.mxu0 %v1271_v8 }
  0x30   : > { %1127 = vmatpush3.bf16.msra.mxu1 %v1126_v23 }
  0x31   : > { %1128 = vmatprep.subr.bf16.mxu1 %v1271_v8 }
  0x32   : > { %1106 = vmatpush3.bf16.msra.mxu0 %v1105_v39 }
  0x33   : > { %1107 = vmatprep.subr.bf16.mxu0 %v1271_v8 }
  0x34   : > { %1130 = vmatpush3.bf16.msra.mxu1 %v1129_v26 }
  0x35   : > { %1131 = vmatprep.subr.bf16.mxu1 %v1271_v8 }
  0x36   : > { %1109 = vmatpush3.bf16.msra.mxu0 %v1108_v42 }
  0x37   : > { %1110 = vmatprep.subr.bf16.mxu0 %v1271_v8 }
  0x38   : > { %1133 = vmatpush3.bf16.msra.mxu1 %v1132_v32 }
  0x39   : > { %1134 = vmatprep.subr.bf16.mxu1 %v1271_v8  ;;  %v1275_v8 = vmov 0  }
  0x3a   : > { %1112 = vmatpush3.bf16.msra.mxu0 %v1111_v45  ;;  %1183 = vset.pattern.permute.xlu1 %v1275_v8 }
  0x3c   : > { %1136 = vmatpush3.bf16.msra.mxu1 %v1135_v36 }
  0xf0   : > { %v376_v4 = vpop.f32.mrb[0].mxu0  ;;  %v447_v10 = vpop.f32.mrb[0].mxu1 }
  0xf1   : > { %v377_v6 = vadd.f32 %v376_v4, %v294_v0  ;;  %v378_v7 = vpop.f32.mrb[1].mxu0  ;;  %v448_v11 = vadd.f32 %v447_v10, %v302_v3  ;;  %v1004_v13 = vpop.f32.mrb[1].mxu1 }
  0xf2   : > { %v379_v9 = vadd.f32 %v378_v7, %v298_v2 }
  0xf3   : > { %v458_v12 = vmul.f32 %v949_v5, %v377_v6  ;;  %v568_v17 = vsel %vm567_vm3, %v448_v11, -inf }
  0xf4   : > { %v460_v14 = vmul.f32 0.044715, %v379_v9  ;;  %v459_v28 = vmul.f32 0.5, %v379_v9 }
  0xf5   : > { %v604_v15 = vsel %vm603_vm2, %v458_v12, -1e+30 }
  0xf6   : > { %v461_v16 = vmul.f32 %v460_v14, %v379_v9  ;;  %605 = vmax.xlane.f32.xlu0 %v604_v15 }
  0xf8   : > { %v462_v18 = vmul.f32 %v461_v16, %v379_v9 }
  0xfa   : > { %v463_v19 = vadd.f32 %v462_v18, %v379_v9  ;;  %569 = vmax.xlane.f32.xlu0 %v568_v17 }
  0xfc   : > { %v464_v20 = vmul.f32 0.7978846, %v463_v19 }
  0xfe   : > { %1191 = vtanh.f32 %v464_v20 }
 0x108   : > { %v1192_v27 = vpop.eup %1191 }
 0x109   : > { %v466_v29 = vadd.f32 1.0, %v1192_v27 }
 0x10b   : > { %v467_v33 = vmul.f32 %v466_v29, %v459_v28  ;;  %v1596_v29 = vcvt.s32.f32 %v1506_v1 }
 0x10d   : > { %1038 = vmatmul.mubr.f32.vlgmr.msra.gmra.mrb[2].mxu0 %v467_v33 }
 0x183   : > { %v606_v37 = vpop.xlane.xlu0 %605 }
 0x184   : > { %v607_v38 = vsub.f32 %v604_v15, %v606_v37 }
 0x186   : > { %v608_v39 = vmul.f32 1.442695, %v607_v38 }
 0x187   : > { %v570_v40 = vpop.xlane.xlu0 %569 }
 0x188   : > { %1193 = vpow2.f32 %v608_v39  ;;  %v571_v41 = vsub.f32 %v448_v11, %v570_v40 }
 0x18a   : > { %v572_v42 = vmul.f32 1.442695, %v571_v41 }
 0x18c   : > { %1195 = vpow2.f32 %v572_v42 }
 0x192   : > { %v1542_v43 = vpop.eup %1193 }
 0x193   : > { %1073 = vmatmul.mubr.f32.vlgmr.msra.gmra.mrb[2].mxu1 %v1542_v43 }
 0x196   : > { %v1196_v44 = vpop.eup %1195 }
 0x197   : > { %v574_v45 = vsel %vm567_vm3, %v1196_v44, 0.0 }
 0x198   : > { %575 = vadd.xlane.f32.xlu1 %v574_v45 }
 0x1e0   : > { %v557_v47 = vpop.f32.mrb[2].mxu0 }
 0x1e1   : > { %v1039_v48 = vpop.f32.mrb[3].mxu0  ;;  %v558_v50 = vadd.f32 %v950_v49, %v557_v47 }
 0x1e3   : > { %v561_v51 = vsub.f32 0.0, %v558_v50 }
 0x1e5   : > { %v562_v52 = vmul.f32 1.442695, %v561_v51 }
 0x1e7   : > { %1197 = vpow2.f32 %v562_v52 }
 0x1f1   : > { %v1198_v53 = vpop.eup %1197 }
 0x1f2   : > { %v564_v54 = vadd.f32 1.0, %v1198_v53 }
 0x1f4   : > { %1199 = vrcp.f32 %v564_v54 }
 0x1fe   : > { %v1200_v56 = vpop.eup %1199 }
 0x1ff   : > { %v740_v58 = vsub.f32 1.0, %v1200_v56 }
 0x201   : > { %v741_v60 = vmul.f32 0.5, %v740_v58 }
 0x225   : > { %v576_v62 = vpop.xlane.xlu1 %575 }
 0x226   : > { %1201 = vrcp.f32 %v576_v62 }
 0x230   : > { %v1202_v63 = vpop.eup %1201 }
 0x231   : > { %v1548_v0 = vmul.f32 %v1202_v63, %v1196_v44 }
 0x233   : > { %v582_v2 = vsel %vm567_vm3, %v1548_v0, -inf }
 0x266   : > { %v703_v55 = vpop.f32.mrb[2].mxu1 }
 0x267   : > { %714 = vperm.xlu0 %1184, %v703_v55   ;;  %v1074_v57 = vpop.f32.mrb[3].mxu1  ;;  %709 = vperm.xlu1 %1183, %v703_v55  }
 0x26b   : > { %1187 = vset.pattern.permute.xlu0 %v1275_v8  ;;  %1185 = vset.pattern.permute.xlu1 %v1276_v59 }
 0x26c   : > { %736 = vperm.xlu0 %1187, %v1200_v56   ;;  %720 = vperm.xlu1 %1185, %v703_v55  }
 0x270   : > { %744 = vperm.xlu0 %1187, %v741_v60   ;;  %1186 = vset.pattern.permute.xlu1 %v1277_v61 }
 0x271   : > { %726 = vperm.xlu1 %1186, %v703_v55  }
 0x275   : > { %1188 = vset.pattern.permute.xlu1 %v1274_v46 }
 0x295   : > { %583 = vmax.xlane.f32.xlu1 %v582_v2 }
 0x2e6   : > { %v710_v3 = vpop.permute.xlu1 %709  ;;  %v715_v5 = vpop.permute.xlu0 %714 }
 0x2e7   : > { %v712_v7 = vsel %vm611_vm8, %v710_v3, 0.0  ;;  %v717_v9 = vsel %vm1557_vm9, %v715_v5, 0.0 }
 0x2e8   : > { %v718_v13 = vadd.f32 %v717_v9, %v712_v7 }
 0x2eb   : > { %v721_v10 = vpop.permute.xlu1 %720  ;;  %v737_v19 = vpop.permute.xlu0 %736 }
 0x2ec   : > { %v723_v11 = vsel %vm1561_vm10, %v721_v10, 0.0 }
 0x2ed   : > { %v724_v14 = vadd.f32 %v723_v11, %v718_v13 }
 0x2ef   : > { %v745_v23 = vpop.permute.xlu0 %744 }
 0x2f0   : > { %v727_v15 = vpop.permute.xlu1 %726 }
 0x2f1   : > { %v729_v16 = vsel %vm1574_vm12, %v727_v15, 0.0 }
 0x2f2   : > { %v730_v17 = vadd.f32 %v729_v16, %v724_v14 }
 0x2f4   : > { %v731_v18 = vadd.f32 1e-30, %v730_v17 }
 0x2f6   : > { %1203 = vrcp.f32 %v731_v18 }
 0x300   : > { %v1204_v20 = vpop.eup %1203 }
 0x301   : > { %v733_v21 = vmul.f32 %v1204_v20, %v1542_v43 }
 0x303   : > { %v739_v22 = vmul.f32 %v737_v19, %v733_v21 }
 0x305   : > { %v1581_v24 = vadd.f32 %v745_v23, %v739_v22 }
 0x307   : > { %v771_v25 = vsel %vm1557_vm9, %v1581_v24, -1e+30  ;;  %v748_v26 = vsel %vm611_vm8, %v1581_v24, -1e+30  ;;  %v795_v27 = vsel %vm1561_vm10, %v1581_v24, -1e+30 }
 0x308   : > { %772 = vmax.xlane.f32.xlu1 %v771_v25  ;;  %749 = vmax.xlane.f32.xlu0 %v748_v26  ;;  %v819_v28 = vsel %vm1574_vm12, %v1581_v24, -1e+30 }
 0x30c   : > { %796 = vmax.xlane.f32.xlu1 %v795_v27 }
 0x310   : > { %820 = vmax.xlane.f32.xlu1 %v819_v28 }
 0x322   : > { %v584_v30 = vpop.xlane.xlu1 %583 }
 0x323   : > { %vm585_vm13 = vcmp.eq.f32.partialorder %v1548_v0, %v584_v30 }
 0x324   : > { %v586_v31 = vsel %vm585_vm13, %v1596_v29, 4.0 }
 0x325   : > { %v587_v32 = vsel %vm567_vm3, %v586_v31, inf }
 0x326   : > { %588 = vmin.xlane.f32.xlu1 %v587_v32 }
 0x395   : > { %v773_v33 = vpop.xlane.xlu1 %772  ;;  %v750_v34 = vpop.xlane.xlu0 %749 }
 0x396   : > { %vm751_vm14 = vcmp.eq.f32.partialorder %v748_v26, %v750_v34  ;;  %vm774_vm15 = vcmp.eq.f32.partialorder %v771_v25, %v773_v33 }
 0x397   : > { %v752_v35 = vsel %vm751_vm14, %v1596_v29, 128.0  ;;  %v775_v37 = vsel %vm774_vm15, %v1596_v29, 128.0 }
 0x398   : > { %753 = vmin.xlane.f32.xlu1 %v752_v35 }
 0x399   : > { %v797_v36 = vpop.xlane.xlu1 %796 }
 0x39a   : > { %vm798_vm0 = vcmp.eq.f32.partialorder %v795_v27, %v797_v36 }
 0x39b   : > { %v799_v39 = vsel %vm798_vm0, %v1596_v29, 128.0 }
 0x39c   : > { %776 = vmin.xlane.f32.xlu1 %v775_v37 }
 0x39d   : > { %v821_v38 = vpop.xlane.xlu1 %820 }
 0x39e   : > { %vm822_vm1 = vcmp.eq.f32.partialorder %v819_v28, %v821_v38 }
 0x39f   : > { %v823_v40 = vsel %vm822_vm1, %v1596_v29, 128.0 }
 0x3a0   : > { %800 = vmin.xlane.f32.xlu1 %v799_v39 }
 0x3a4   : > { %824 = vmin.xlane.f32.xlu1 %v823_v40 }
 0x3b3   : > { %v589_v41 = vpop.xlane.xlu1 %588 }
 0x3b4   : > { %vm590_vm2 = vcmp.eq.f32.partialorder %v1596_v29, %v589_v41 }
 0x3b5   : > { %v591_v42 = vsel %vm590_vm2, -1e+30, %v1548_v0 }
 0x3b6   : > { %v592_v43 = vsel %vm567_vm3, %v591_v42, -inf }
 0x3b7   : > { %593 = vmax.xlane.f32.xlu0 %v592_v43 }
 0x425   : > { %v754_v44 = vpop.xlane.xlu1 %753 }
 0x426   : > { %vm755_vm7 = vcmp.eq.f32.partialorder %v1596_v29, %v754_v44 }
 0x427   : > { %v756_v52 = vsel %vm755_vm7, -1e+30, %v748_v26 }
 0x429   : > { %v777_v45 = vpop.xlane.xlu1 %776 }
 0x42a   : > { %vm778_vm4 = vcmp.eq.f32.partialorder %v1596_v29, %v777_v45 }
 0x42b   : > { %v779_v46 = vsel %vm778_vm4, -1e+30, %v771_v25 }
 0x42c   : > { %780 = vmax.xlane.f32.xlu0 %v779_v46 }
 0x42d   : > { %v801_v8 = vpop.xlane.xlu1 %800 }
 0x42e   : > { %vm802_vm11 = vcmp.eq.f32.partialorder %v1596_v29, %v801_v8 }
 0x42f   : > { %v803_v53 = vsel %vm802_vm11, -1e+30, %v795_v27 }
 0x431   : > { %v825_v47 = vpop.xlane.xlu1 %824 }
 0x432   : > { %vm826_vm5 = vcmp.eq.f32.partialorder %v1596_v29, %v825_v47 }
 0x433   : > { %v827_v48 = vsel %vm826_vm5, -1e+30, %v819_v28 }
 0x434   : > { %828 = vmax.xlane.f32.xlu0 %v827_v48 }
 0x444   : > { %v594_v49 = vpop.xlane.xlu0 %593 }
 0x445   : > { %vm595_vm6 = vcmp.eq.f32.partialorder %v591_v42, %v594_v49 }
 0x446   : > { %v596_v50 = vsel %vm595_vm6, %v1596_v29, 4.0 }
 0x447   : > { %v597_v51 = vsel %vm567_vm3, %v596_v50, inf }
 0x448   : > { %598 = vmin.xlane.f32.xlu1 %v597_v51 }
 0x44c   : > { %757 = vmax.xlane.f32.xlu1 %v756_v52 }
 0x450   : > { %804 = vmax.xlane.f32.xlu1 %v803_v53 }
 0x4b9   : > { %v781_v58 = vpop.xlane.xlu0 %780 }
 0x4ba   : > { %vm782_vm0 = vcmp.eq.f32.partialorder %v779_v46, %v781_v58 }
 0x4c1   : > { %v829_v62 = vpop.xlane.xlu0 %828 }
 0x4c2   : > { %vm830_vm1 = vcmp.eq.f32.partialorder %v827_v48, %v829_v62 }
 0x4d5   : > { %v599_v54 = vpop.xlane.xlu1 %598 }
 0x4d6   : > { %vm600_vm13 = vcmp.eq.f32.partialorder %v1596_v29, %v599_v54 }
 0x4d7   : > { %vm601_vm14 = vmor %vm590_vm2, %vm600_vm13 }
 0x4d8   : > { %v602_v55 = vsel %vm601_vm14, %v1548_v0, 0.0  ;;  %v783_v0 = vsel %vm782_vm0, %v1596_v29, 128.0 }
 0x4d9   : > { %790 = vperm.xlu1 %1188, %v602_v55   ;;  %767 = vperm.xlu0 %1187, %v602_v55   ;;  %v758_v56 = vpop.xlane.xlu1 %757 }
 0x4da   : > { %vm759_vm3 = vcmp.eq.f32.partialorder %v756_v52, %v758_v56 }
 0x4db   : > { %v760_v60 = vsel %vm759_vm3, %v1596_v29, 128.0 }
 0x4dd   : > { %1189 = vset.pattern.permute.xlu1 %v1276_v59  ;;  %1190 = vset.pattern.permute.xlu0 %v1277_v61  ;;  %v805_v57 = vpop.xlane.xlu1 %804  ;;  %v831_v59 = vsel %vm830_vm1, %v1596_v29, 128.0 }
 0x4de   : > { %vm806_vm15 = vcmp.eq.f32.partialorder %v803_v53, %v805_v57 }
 0x4df   : > { %v807_v63 = vsel %vm806_vm15, %v1596_v29, 128.0 }
 0x4f8   : > { %761 = vmin.xlane.f32.xlu0 %v760_v60 }
 0x4fc   : > { %808 = vmin.xlane.f32.xlu0 %v807_v63 }
 0x4fd   : > { %784 = vmin.xlane.f32.xlu1 %v783_v0 }
 0x501   : > { %832 = vmin.xlane.f32.xlu1 %v831_v59 }
 0x512   : > { %838 = vperm.xlu0 %1190, %v602_v55   ;;  %814 = vperm.xlu1 %1189, %v602_v55  }
 0x558   : > { %v768_v61 = vpop.permute.xlu0 %767  ;;  %v791_v2 = vpop.permute.xlu1 %790 }
 0x559   : > { %v793_v10 = vsel %vm1557_vm9, %v791_v2, 0.0  ;;  %v770_v11 = vsel %vm611_vm8, %v768_v61, 0.0 }
 0x55a   : > { %v794_v13 = vadd.f32 %v793_v10, %v770_v11 }
 0x585   : > { %v762_v3 = vpop.xlane.xlu0 %761 }
 0x586   : > { %vm763_vm6 = vcmp.eq.f32.partialorder %v1596_v29, %v762_v3 }
 0x587   : > { %vm764_vm14 = vmor %vm755_vm7, %vm763_vm6 }
 0x589   : > { %v809_v7 = vpop.xlane.xlu0 %808 }
 0x58a   : > { %v785_v5 = vpop.xlane.xlu1 %784  ;;  %vm810_vm3 = vcmp.eq.f32.partialorder %v1596_v29, %v809_v7 }
 0x58b   : > { %vm786_vm2 = vcmp.eq.f32.partialorder %v1596_v29, %v785_v5 }
 0x58c   : > { %vm787_vm13 = vmor %vm778_vm4, %vm786_vm2 }
 0x58d   : > { %vm788_vm0 = vmor %vm764_vm14, %vm787_vm13 }
 0x58e   : > { %v833_v9 = vpop.xlane.xlu1 %832  ;;  %vm811_vm4 = vmor %vm802_vm11, %vm810_vm3 }
 0x58f   : > { %vm834_vm15 = vcmp.eq.f32.partialorder %v1596_v29, %v833_v9  ;;  %vm812_vm9 = vmor %vm788_vm0, %vm811_vm4 }
 0x590   : > { %vm835_vm1 = vmor %vm826_vm5, %vm834_vm15 }
 0x591   : > { %v839_v4 = vpop.permute.xlu0 %838  ;;  %vm836_vm8 = vmor %vm812_vm9, %vm835_vm1 }
 0x592   : > { %v815_v14 = vpop.permute.xlu1 %814  ;;  %v841_v16 = vsel %vm1574_vm12, %v839_v4, 0.0  ;;  %v843_v18 = vsel %vm836_vm8, %v1581_v24, 0.0 }
 0x593   : > { %v817_v1 = vsel %vm1561_vm10, %v815_v14, 0.0 }
 0x594   : > { %v818_v15 = vadd.f32 %v817_v1, %v794_v13 }
 0x596   : > { %v842_v17 = vadd.f32 %v841_v16, %v818_v15 }
 0x598   : > { %v844_v19 = vmul.f32 %v843_v18, %v842_v17 }
 0x59a   : > { %845 = vadd.xlane.f32.xlu1 %v844_v19 }
 0x627   : > { %v846_v20 = vpop.xlane.xlu1 %845 }
 0x628   : > { %v847_v21 = vadd.f32 1e-09, %v846_v20 }
 0x62a   : > { %1205 = vrcp.f32 %v847_v21 }
 0x634   : > { %v1206_v22 = vpop.eup %1205 }
 0x635   : > { %v849_v23 = vmul.f32 %v1206_v22, %v844_v19 }
 0x637   : > { %850 = vmax.xlane.f32.xlu0 %v849_v23 }
 0x6c4   : > { %v851_v6 = vpop.xlane.xlu0 %850 }
 0x6c5   : > { %vm852_vm10 = vcmp.eq.f32.partialorder %v849_v23, %v851_v6 }
 0x6c6   : > { %v853_v25 = vsel %vm852_vm10, %v1596_v29, 128.0 }
 0x6c7   : > { %854 = vmin.xlane.f32.xlu1 %v853_v25 }
 0x754   : > { %v855_v12 = vpop.xlane.xlu1 %854 }
 0x755   : > { %vm856_vm12 = vcmp.eq.f32.partialorder %v1596_v29, %v855_v12 }
 0x756   : > { %v857_v26 = vsel %vm856_vm12, -1e+30, %v849_v23 }
 0x757   : > { %858 = vmax.xlane.f32.xlu0 %v857_v26 }
 0x7e4   : > { %v859_v24 = vpop.xlane.xlu0 %858 }
 0x7e5   : > { %vm860_vm5 = vcmp.eq.f32.partialorder %v857_v26, %v859_v24 }
 0x7e6   : > { %v861_v27 = vsel %vm860_vm5, %v1596_v29, 128.0 }
 0x7e7   : > { %862 = vmin.xlane.f32.xlu1 %v861_v27 }
 0x874   : > { %v863_v28 = vpop.xlane.xlu1 %862 }
 0x875   : > { %vm864_vm7 = vcmp.eq.f32.partialorder %v1596_v29, %v863_v28 }
 0x876   : > { %vm865_vm11 = vmor %vm856_vm12, %vm864_vm7 }
 0x877   : > { %v866_v30 = vsel %vm865_vm11, %v849_v23, 0.0 }
 0x878   : > { %867 = vst [vmem:[%s271_s24] sm:$0xff] %v866_v30 }
 0x879   : > { %1220 = shalt.err (!%p1217_p3)
}
 0x87a   : > { %s1221_s18 = scalar_lea.hbm %s1664_s10, 128  ;;  %s1225_s21 = scalar_lea.hbm %s1713_s7, 256 }
 0x87b   : > { %p1222_p4 = scmp.ne.s32.totalorder %s1664_s10, %s1221_s18  ;;  %p1226_p9 = scmp.lt.u32.totalorder %s1664_s10, %s1713_s7 }
 0x87c   : > { %p1227_p10 = scmp.lt.u32.totalorder %s1225_s21, %s1221_s18  ;;  %p1229_p12 = scmp.lt.u32.totalorder %s1221_s18, %s1664_s10 }
 0x87d   : > { %p1223_p7 = pnand %p1222_p4, %p1360_p5 }
 0x87e   : > { %p1228_p11 = por %p1227_p10, %p1226_p9 }
 0x87f   : > { %p1224_p8 = pneg %p1223_p7 }
 0x880   : > { %p1230_p13 = por %p1229_p12, %p1228_p11 }
 0x882   : > { %p1231_p0 = pnand %p1230_p13, %p1224_p8 }
 0x884   : > { %1234 = shalt.err (!%p1231_p0)
}
 0x885   : > { %1137 = dma.vmem_to_hbm [thread:$0]  (%p1360_p5), %s1666_s25, 128, %s1664_s10, %s869_s14  }
 0x886 PF: > { %p1143_p1 = scmp.ge.s32.totalorder %s1269_s29, 2  ;;  %s894_s24 = sand.u32 1, %s1257_s26  }
 0x887   : > { %s895_s30 = scalar_lea.sflag [#allocation4], %s894_s24 }
 0x888   : > { %p1140_p2 = pnand %p1143_p1, %p1364_p6 }
 0x88a   : > { %1252 = dma.done.wait (!%p1140_p2), %s895_s30, 128  }
 0x88b   : > { %1254 = vsyncadd (!%p1140_p2), %s895_s30, 4294967168  ;;  %p19_p3 = scmp.ge.s32.totalorder %s1347_s8, 4   ;;  %s1722_s26 = smov %s1261_s27 }
 0x88c   : > { %s1723_s27 = smov %s1265_s28  ;;  %s1724_s28 = smov %s1358_s11 }
 0x88d   : > { %s1725_s29 = smov %s1347_s8  ;;  %21 = sbr.rel (!%p19_p3) target bundleno = 6 (0x6), region = 83 }
 0x894   :  { %900 = vsyncpa [#allocation4], 1 }
 0x895   :  { %902 = vsyncpa [#allocation4 + $0x1], 1 }

// kernel: tpu_custom_call.1
= control target key start
LH: loop header
LB: loop body
LE: loop exit
PB: predicated region body
PF: predicated region fallthrough
CT: control target
= control target key end

     0   :  { %s1706_s0 = inlined_call_operand.vmem [shape: f32[16,32], index: 0, kind: input, shape index: {}]   ;;  %s1707_s1 = inlined_call_operand.vmem [shape: f32[32,260], index: 1, kind: input, shape index: {}]   ;;  %s1708_s2 = inlined_call_operand.vmem [shape: f32[1,260], index: 2, kind: input, shape index: {}]   ;;  %s1709_s3 = inlined_call_operand.vmem [shape: f32[1,128], index: 3, kind: input, shape index: {}]   ;;  %s1710_s4 = inlined_call_operand.vmem [shape: f32[128,4], index: 4, kind: input, shape index: {}]   ;;  %s1711_s5 = inlined_call_operand.vmem [shape: f32[128,1], index: 5, kind: input, shape index: {}]   ;;  %s1712_s6 = inlined_call_operand.<no memory space> [shape: f32[1,1], index: 6, kind: input, shape index: {}]   ;;  %s1713_s7 = inlined_call_operand.hbm [shape: f32[16,128], index: 7, kind: output, shape index: {}]  }
   0x1   :  { %v12_v0 = vstv %s1712_s6 }
   0x2   :  { %13 = vst [vmem:[#allocation2] sm:$0x1] %v12_v0 }
   0x3   :  { %14 = vsyncpa [#allocation4], 0 }
   0x4   :  { %16 = vsyncpa [#allocation4 + $0x1], 0  ;;  %s1322_s26 = smov 0   ;;  %s1324_s27 = smov 0  }
   0x5   :  { %s1326_s28 = smov 0   ;;  %s1328_s29 = smov 0  }
   0x6 LB: > { %s1343_s6 = sadd.s32 4294967295, %s1269_s29   ;;  %s941_s30 = sadd.s32 4294967294, %s1269_s29   ;;  %s1269_s29 = sphi %s1328_s29, %s1725_s29   ;;  %s1265_s28 = sphi %s1326_s28, %s1724_s28   ;;  %s1261_s27 = sphi %s1324_s27, %s1723_s27   ;;  %s1257_s26 = sphi %s1322_s26, %s1722_s26  }
   0x7   : > { %s1347_s8 = sadd.s32 1, %s1269_s29   ;;  %s181_s9 = sadd.s32 1, %s1265_s28 }
   0x8   : > { %s178_s10 = ssub.s32 %s1269_s29, %s1347_s8  ;;  %p191_p0 = scmp.ne.s32.totalorder %s1265_s28, %s1261_s27 }
   0x9   : > { %p179_p1 = scmp.eq.s32.totalorder %s178_s10, 0  ;;  %p192_p2 = scmp.eq.s32.totalorder %s1343_s6, 1 }
   0xa   : > { %p197_p3 = scmp.ne.s32.totalorder %s1261_s27, %s1257_s26  ;;  %p198_p4 = scmp.eq.s32.totalorder %s941_s30, 1 }
   0xb   : > { %s1358_s11 = scalar_select %p179_p1, %s1265_s28, %s181_s9  }
   0xc   : > { %p1360_p5 = por %p192_p2, %p191_p0  ;;  %p1364_p6 = por %p198_p4, %p197_p3 }
   0xd   : > { %p944_p7 = scmp.ge.s32.totalorder %s1269_s29, 1  ;;  %p241_p8 = scmp.lt.s32.totalorder %s1269_s29, 3 }
   0xf   : > { %p242_p9 = pnand %p944_p7, %p241_p8 }
  0x10   : > { %v278_v1 = vld [vmem:[%s1707_s1 + $0x8] sm:$0xff] (!%p242_p9)  ;;  %v281_v2 = vld [vmem:[%s1707_s1 + $0x20] sm:$0xff] (!%p242_p9)  ;;  %p272_p10 = scmp.lt.s32.totalorder (!%p242_p9), %s1343_s6, 1  ;;  %v280_v5 = vld [vmem:[%s1707_s1 + $0x18] sm:$0xff] (!%p242_p9)  ;;  %v1271_v8 = vmov (!%p242_p9), 0.0|0.0   ;;  %v1272_v9 = vmov (!%p242_p9), 0.0   ;;  %v291_v58 = vlaneseq (!%p242_p9) }
  0x11   : > { %245 = sbr.rel (%p242_p9) target bundleno = 2182 (0x886), region = 48  ;;  %v277_v3 = vld [vmem:[%s1707_s1] sm:$0xff] (!%p242_p9)  ;;  %v1075_v4 = vpack.c.bf16 (!%p242_p9), %v281_v2, %v278_v1  ;;  %v284_v6 = vld [vmem:[%s1707_s1 + $0x38] sm:$0xff] (!%p242_p9)  ;;  %v287_v7 = vld [vmem:[%s1707_s1 + $0x50] sm:$0xff] (!%p242_p9)  ;;  %1083 = vmatprep.subr.bf16.mxu1 (!%p242_p9), %v1271_v8  ;;  %374 = vmatprep.mubr.f32.mxu0 (!%p242_p9), %v1272_v9  ;;  %vm1273_vm0 = vmmov (!%p242_p9), 0   ;;  %vm306_vm1 = vcmask (!%p242_p9), 261120  }
  0x12   : > { %v1077_v10 = vpack.c.bf16 (!%p242_p9), %v280_v5, %v277_v3  ;;  %v1079_v11 = vpack.c.bf16 (!%p242_p9), %v287_v7, %v284_v6  ;;  %v283_v12 = vld [vmem:[%s1707_s1 + $0x30] sm:$0xff] (!%p242_p9)  ;;  %v286_v13 = vld [vmem:[%s1707_s1 + $0x48] sm:$0xff] (!%p242_p9)  ;;  %1002 = vmatprep.mubr.msk.f32.mxu1 (!%p242_p9), %vm1273_vm0, %v1272_v9  ;;  %v285_v16 = vld [vmem:[%s1707_s1 + $0x40] sm:$0xff] (!%p242_p9)  ;;  %v292_v59 = vshrl.u32 (!%p242_p9), %v291_v58, 7  ;;  %v1506_v1 = vand.u32 (!%p242_p9), 127, %v291_v58  ;;  %s269_s21 = sand.u32 (!%p242_p9), 1, %s1261_s27  }
  0x13   : > { %v279_v14 = vld [vmem:[%s1707_s1 + $0x10] sm:$0xff] (!%p242_p9)  ;;  %1076 = vmatprep.subr.bf16.mxu0 (!%p242_p9), %v1075_v4  ;;  %v282_v15 = vld [vmem:[%s1707_s1 + $0x28] sm:$0xff] (!%p242_p9)  ;;  %v288_v17 = vld [vmem:[%s1707_s1 + $0x58] sm:$0xff] (!%p242_p9)  ;;  %v1081_v18 = vpack.c.bf16 (!%p242_p9), %v286_v13, %v283_v12  ;;  %vm567_vm3 = vcmask (!%p242_p9), 31744   ;;  %s945_s22 = sshll.u32 (!%p242_p9), %s269_s21, 3  ;;  %s952_s23 = sshll.u32 (!%p242_p9), %s1343_s6, 7 }
  0x14   : > { %1078 = vmatpush1.bf16.msra.mxu0 (!%p242_p9), %v1077_v10  ;;  %v1084_v19 = vpack.c.bf16 (!%p242_p9), %v282_v15, %v279_v14  ;;  %v468_v20 = vld [vmem:[%s1711_s5] sm:$0xff] (!%p242_p9)  ;;  %v469_v21 = vld [vmem:[%s1711_s5 + $0x8] sm:$0xff] (!%p242_p9)  ;;  %v1087_v22 = vpack.c.bf16 (!%p242_p9), %v288_v17, %v285_v16  ;;  %v470_v25 = vld [vmem:[%s1711_s5 + $0x10] sm:$0xff] (!%p242_p9)  ;;  %v293_v60 = vsub.s32 (!%p242_p9), 0, %v292_v59  ;;  %v297_v62 = vsub.s32 (!%p242_p9), 1, %v292_v59  ;;  %s1664_s10 = scalar_lea.hbm (!%p242_p9), %s1713_s7, %s952_s23  ;;  %s869_s14 = scalar_lea.sflag (!%p242_p9), [#allocation4], %s269_s21 }
  0x15   : > { %1080 = vmatprep.subr.bf16.mxu0 (!%p242_p9), %v1079_v11  ;;  %v1090_v24 = vpack.c.bf16 (!%p242_p9), %v469_v21, %v468_v20  ;;  %v471_v26 = vld [vmem:[%s1711_s5 + $0x18] sm:$0xff] (!%p242_p9)  ;;  %v472_v28 = vld [vmem:[%s1711_s5 + $0x20] sm:$0xff] (!%p242_p9)  ;;  %v473_v29 = vld [vmem:[%s1711_s5 + $0x28] sm:$0xff] (!%p242_p9)  ;;  %v301_v63 = vsub.s32 (!%p242_p9), 2, %v292_v59  ;;  %vm603_vm2 = vcmp.lt.s32.totalorder (!%p242_p9), %v1506_v1, 8  ;;  %v1276_v59 = vmov (!%p242_p9), 2  }
  0x16   : > { %1085 = vmatpush3.bf16.msra.mxu1 (!%p242_p9), %v1084_v19  ;;  %v1093_v27 = vpack.c.bf16 (!%p242_p9), %v471_v26, %v470_v25  ;;  %v1096_v30 = vpack.c.bf16 (!%p242_p9), %v473_v29, %v472_v28  ;;  %v474_v31 = vld [vmem:[%s1711_s5 + $0x30] sm:$0xff] (!%p242_p9)  ;;  %v475_v32 = vld [vmem:[%s1711_s5 + $0x38] sm:$0xff] (!%p242_p9)  ;;  %v476_v34 = vld [vmem:[%s1711_s5 + $0x40] sm:$0xff] (!%p242_p9)  ;;  %vm613_vm4 = vcmp.ge.s32.totalorder (!%p242_p9), %v1506_v1, 2  ;;  %vm614_vm5 = vcmp.lt.s32.totalorder (!%p242_p9), %v1506_v1, 4  ;;  %s1278_s15 = smov (!%p242_p9), [#allocation3]  }
  0x17   : > { %1086 = vmatprep.subr.bf16.mxu1 (!%p242_p9), %v1271_v8  ;;  %v1099_v33 = vpack.c.bf16 (!%p242_p9), %v475_v32, %v474_v31  ;;  %v477_v35 = vld [vmem:[%s1711_s5 + $0x48] sm:$0xff] (!%p242_p9)  ;;  %v478_v37 = vld [vmem:[%s1711_s5 + $0x50] sm:$0xff] (!%p242_p9)  ;;  %v479_v38 = vld [vmem:[%s1711_s5 + $0x58] sm:$0xff] (!%p242_p9)  ;;  %vm616_vm6 = vcmp.ge.s32.totalorder (!%p242_p9), %v1506_v1, 4  ;;  %vm617_vm7 = vcmp.lt.s32.totalorder (!%p242_p9), %v1506_v1, 6  ;;  %vm611_vm8 = vcmp.lt.s32.totalorder (!%p242_p9), %v1506_v1, 2 }
  0x18   : > { %s273_s17 = scalar_select %p272_p10, %s1343_s6, 1  ;;  %1082 = vmatpush1.bf16.msra.mxu0 %v1081_v18  ;;  %v1102_v36 = vpack.c.bf16 %v477_v35, %v476_v34  ;;  %v1105_v39 = vpack.c.bf16 %v479_v38, %v478_v37  ;;  %v480_v40 = vld [vmem:[%s1711_s5 + $0x60] sm:$0xff]  ;;  %v481_v41 = vld [vmem:[%s1711_s5 + $0x68] sm:$0xff]  ;;  %v482_v43 = vld [vmem:[%s1711_s5 + $0x70] sm:$0xff]  ;;  %vm619_vm11 = vcmp.ge.s32.totalorder %v1506_v1, 6 }
  0x19   : > { %1089 = vmatprep.subr.bf16.mxu0 %v1271_v8  ;;  %v1108_v42 = vpack.c.bf16 %v481_v41, %v480_v40  ;;  %v483_v44 = vld [vmem:[%s1711_s5 + $0x78] sm:$0xff]  ;;  %v621_v46 = vld [vmem:[%s1710_s4] sm:$0xff]  ;;  %v622_v47 = vld [vmem:[%s1710_s4 + $0x8] sm:$0xff]  ;;  %s1211_s16 = sshll.u32 %s1278_s15, 4  ;;  %s1212_s16 = int_to_ptr.vmem [resolvable:$false] %s1211_s16 }
  0x1a   : > { %s946_s24 = sshll.u32 %s273_s17, 3  ;;  %1088 = vmatpush3.bf16.msra.mxu1 %v1087_v22  ;;  %v1111_v45 = vpack.c.bf16 %v483_v44, %v482_v43  ;;  %v623_v48 = vld [vmem:[%s1710_s4 + $0x10] sm:$0xff]  ;;  %v1114_v49 = vpack.c.bf16 %v622_v47, %v621_v46  ;;  %v624_v50 = vld [vmem:[%s1710_s4 + $0x18] sm:$0xff]  ;;  %v625_v52 = vld [vmem:[%s1710_s4 + $0x20] sm:$0xff]  ;;  %v1274_v46 = vmov 1   ;;  %s1213_s17 = scalar_lea.vmem %s1212_s16, 256 }
  0x1b   : > { %s275_s9 = scalar_lea.vmem %s1706_s0, %s946_s24  ;;  %1113 = vmatprep.subr.bf16.mxu1 %v1271_v8  ;;  %v1117_v51 = vpack.c.bf16 %v624_v50, %v623_v48  ;;  %v626_v53 = vld [vmem:[%s1710_s4 + $0x28] sm:$0xff]  ;;  %v627_v55 = vld [vmem:[%s1710_s4 + $0x30] sm:$0xff]  ;;  %v628_v56 = vld [vmem:[%s1710_s4 + $0x38] sm:$0xff]  ;;  %1184 = vset.pattern.permute.xlu0 %v1274_v46  ;;  %s271_s24 = scalar_lea.vmem [#allocation3], %s945_s22 }
  0x1c   : > { %v276_v23 = vld [vmem:[%s275_s9] sm:$0xff]  ;;  %v1120_v54 = vpack.c.bf16 %v626_v53, %v625_v52  ;;  %v1123_v57 = vpack.c.bf16 %v628_v56, %v627_v55  ;;  %v630_v22 = vld [vmem:[%s1710_s4 + $0x48] sm:$0xff]  ;;  %v632_v25 = vld [vmem:[%s1710_s4 + $0x58] sm:$0xff]  ;;  %s882_s25 = sshll.u32 %s271_s24, 4  ;;  %s1666_s25 = int_to_ptr.vmem [resolvable:$true] %s882_s25 }
  0x1d   : > { %947 = vmatmul.mubr.msk.f32.vlgmr.msra.gmra.mrb[0].mxu0 %vm306_vm1, %v276_v23  ;;  %1003 = vmatmul.mubr.msk.f32.vlgmr.msra.gmra.mrb[0].mxu1 %vm306_vm1, %v276_v23  ;;  %v289_v61 = vld [vmem:[%s1708_s2] sm:$0x7]  ;;  %v634_v31 = vld [vmem:[%s1710_s4 + $0x68] sm:$0xff]  ;;  %v635_v34 = vld [vmem:[%s1710_s4 + $0x70] sm:$0xff]  ;;  %s1207_s6 = scalar_lea.vmem %s1666_s25, 128  ;;  %p1214_p0 = scmp.lt.s32.totalorder %s1666_s25, %s1212_s16 }
  0x1e   : > { %1091 = vmatpush3.bf16.msra.mxu0 %v1090_v24  ;;  %1037 = vmatprep.mubr.msk.f32.mxu0 %vm1273_vm0, %v1272_v9  ;;  %v294_v0 = vrot.slane %v289_v61, %v293_v60  ;;  %v298_v2 = vrot.slane %v289_v61, %v297_v62  ;;  %v302_v3 = vrot.slane %v289_v61, %v301_v63  ;;  %v949_v5 = vld [vmem:[%s1709_s3] ss:$0 sm:$0xff]  ;;  %v631_v24 = vld [vmem:[%s1710_s4 + $0x50] sm:$0xff]  ;;  %v636_v35 = vld [vmem:[%s1710_s4 + $0x78] sm:$0xff]  ;;  %v1277_v61 = vmov 3   ;;  %p1208_p11 = scmp.ne.s32.totalorder %s1666_s25, %s1207_s6  ;;  %p1215_p1 = scmp.lt.s32.totalorder %s1213_s17, %s1207_s6 }
  0x1f   : > { %1092 = vmatprep.subr.bf16.mxu0 %v1271_v8  ;;  %1072 = vmatprep.mubr.msk.f32.mxu1 %vm1273_vm0, %v1272_v9  ;;  %v629_v21 = vld [vmem:[%s1710_s4 + $0x40] sm:$0xff]  ;;  %v1129_v26 = vpack.c.bf16 %v632_v25, %v631_v24  ;;  %vm1557_vm9 = vmand %vm613_vm4, %vm614_vm5 }
  0x20   : > { %1115 = vmatpush3.bf16.msra.mxu1 %v1114_v49  ;;  %v1126_v23 = vpack.c.bf16 %v630_v22, %v629_v21  ;;  %v950_v49 = vld [vmem:[#allocation2] ss:$0 sm:$0xff]  ;;  %vm1561_vm10 = vmand %vm616_vm6, %vm617_vm7  ;;  %p1209_p12 = pnand %p1208_p11, %p1360_p5  ;;  %p1216_p2 = por %p1215_p1, %p1214_p0 }
  0x21   : > { %1116 = vmatprep.subr.bf16.mxu1 %v1271_v8  ;;  %vm1574_vm12 = vmand %vm619_vm11, %vm603_vm2 }
  0x22   : > { %1094 = vmatpush3.bf16.msra.mxu0 %v1093_v27  ;;  %p1210_p13 = pneg %p1209_p12 }
  0x23   : > { %1095 = vmatprep.subr.bf16.mxu0 %v1271_v8 }
  0x24   : > { %1118 = vmatpush3.bf16.msra.mxu1 %v1117_v51  ;;  %p1217_p3 = pnand %p1216_p2, %p1210_p13 }
  0x25   : > { %1119 = vmatprep.subr.bf16.mxu1 %v1271_v8 }
  0x26   : > { %1097 = vmatpush3.bf16.msra.mxu0 %v1096_v30  ;;  %v633_v30 = vld [vmem:[%s1710_s4 + $0x60] sm:$0xff] }
  0x27   : > { %1098 = vmatprep.subr.bf16.mxu0 %v1271_v8  ;;  %v1132_v32 = vpack.c.bf16 %v634_v31, %v633_v30 }
  0x28   : > { %1121 = vmatpush3.bf16.msra.mxu1 %v1120_v54 }
  0x29   : > { %1122 = vmatprep.subr.bf16.mxu1 %v1271_v8 }
  0x2a   : > { %1100 = vmatpush3.bf16.msra.mxu0 %v1099_v33 }
  0x2b   : > { %1101 = vmatprep.subr.bf16.mxu0 %v1271_v8 }
  0x2c   : > { %1124 = vmatpush3.bf16.msra.mxu1 %v1123_v57 }
  0x2d   : > { %1125 = vmatprep.subr.bf16.mxu1 %v1271_v8 }
  0x2e   : > { %1103 = vmatpush3.bf16.msra.mxu0 %v1102_v36  ;;  %v1135_v36 = vpack.c.bf16 %v636_v35, %v635_v34 }
  0x2f   : > { %1104 = vmatprep.subr.bf16.mxu0 %v1271_v8 }
  0x30   : > { %1127 = vmatpush3.bf16.msra.mxu1 %v1126_v23 }
  0x31   : > { %1128 = vmatprep.subr.bf16.mxu1 %v1271_v8 }
  0x32   : > { %1106 = vmatpush3.bf16.msra.mxu0 %v1105_v39 }
  0x33   : > { %1107 = vmatprep.subr.bf16.mxu0 %v1271_v8 }
  0x34   : > { %1130 = vmatpush3.bf16.msra.mxu1 %v1129_v26 }
  0x35   : > { %1131 = vmatprep.subr.bf16.mxu1 %v1271_v8 }
  0x36   : > { %1109 = vmatpush3.bf16.msra.mxu0 %v1108_v42 }
  0x37   : > { %1110 = vmatprep.subr.bf16.mxu0 %v1271_v8 }
  0x38   : > { %1133 = vmatpush3.bf16.msra.mxu1 %v1132_v32 }
  0x39   : > { %1134 = vmatprep.subr.bf16.mxu1 %v1271_v8  ;;  %v1275_v8 = vmov 0  }
  0x3a   : > { %1112 = vmatpush3.bf16.msra.mxu0 %v1111_v45  ;;  %1183 = vset.pattern.permute.xlu1 %v1275_v8 }
  0x3c   : > { %1136 = vmatpush3.bf16.msra.mxu1 %v1135_v36 }
  0xf0   : > { %v376_v4 = vpop.f32.mrb[0].mxu0  ;;  %v447_v10 = vpop.f32.mrb[0].mxu1 }
  0xf1   : > { %v377_v6 = vadd.f32 %v376_v4, %v294_v0  ;;  %v378_v7 = vpop.f32.mrb[1].mxu0  ;;  %v448_v11 = vadd.f32 %v447_v10, %v302_v3  ;;  %v1004_v13 = vpop.f32.mrb[1].mxu1 }
  0xf2   : > { %v379_v9 = vadd.f32 %v378_v7, %v298_v2 }
  0xf3   : > { %v458_v12 = vmul.f32 %v949_v5, %v377_v6  ;;  %v568_v17 = vsel %vm567_vm3, %v448_v11, -inf }
  0xf4   : > { %v460_v14 = vmul.f32 0.044715, %v379_v9  ;;  %v459_v28 = vmul.f32 0.5, %v379_v9 }
  0xf5   : > { %v604_v15 = vsel %vm603_vm2, %v458_v12, -1e+30 }
  0xf6   : > { %v461_v16 = vmul.f32 %v460_v14, %v379_v9  ;;  %605 = vmax.xlane.f32.xlu0 %v604_v15 }
  0xf8   : > { %v462_v18 = vmul.f32 %v461_v16, %v379_v9 }
  0xfa   : > { %v463_v19 = vadd.f32 %v462_v18, %v379_v9  ;;  %569 = vmax.xlane.f32.xlu0 %v568_v17 }
  0xfc   : > { %v464_v20 = vmul.f32 0.7978846, %v463_v19 }
  0xfe   : > { %1191 = vtanh.f32 %v464_v20 }
 0x108   : > { %v1192_v27 = vpop.eup %1191 }
 0x109   : > { %v466_v29 = vadd.f32 1.0, %v1192_v27 }
 0x10b   : > { %v467_v33 = vmul.f32 %v466_v29, %v459_v28  ;;  %v1596_v29 = vcvt.s32.f32 %v1506_v1 }
 0x10d   : > { %1038 = vmatmul.mubr.f32.vlgmr.msra.gmra.mrb[2].mxu0 %v467_v33 }
 0x183   : > { %v606_v37 = vpop.xlane.xlu0 %605 }
 0x184   : > { %v607_v38 = vsub.f32 %v604_v15, %v606_v37 }
 0x186   : > { %v608_v39 = vmul.f32 1.442695, %v607_v38 }
 0x187   : > { %v570_v40 = vpop.xlane.xlu0 %569 }
 0x188   : > { %1193 = vpow2.f32 %v608_v39  ;;  %v571_v41 = vsub.f32 %v448_v11, %v570_v40 }
 0x18a   : > { %v572_v42 = vmul.f32 1.442695, %v571_v41 }
 0x18c   : > { %1195 = vpow2.f32 %v572_v42 }
 0x192   : > { %v1542_v43 = vpop.eup %1193 }
 0x193   : > { %1073 = vmatmul.mubr.f32.vlgmr.msra.gmra.mrb[2].mxu1 %v1542_v43 }
 0x196   : > { %v1196_v44 = vpop.eup %1195 }
 0x197   : > { %v574_v45 = vsel %vm567_vm3, %v1196_v44, 0.0 }
 0x198   : > { %575 = vadd.xlane.f32.xlu1 %v574_v45 }
 0x1e0   : > { %v557_v47 = vpop.f32.mrb[2].mxu0 }
 0x1e1   : > { %v1039_v48 = vpop.f32.mrb[3].mxu0  ;;  %v558_v50 = vadd.f32 %v950_v49, %v557_v47 }
 0x1e3   : > { %v561_v51 = vsub.f32 0.0, %v558_v50 }
 0x1e5   : > { %v562_v52 = vmul.f32 1.442695, %v561_v51 }
 0x1e7   : > { %1197 = vpow2.f32 %v562_v52 }
 0x1f1   : > { %v1198_v53 = vpop.eup %1197 }
 0x1f2   : > { %v564_v54 = vadd.f32 1.0, %v1198_v53 }
 0x1f4   : > { %1199 = vrcp.f32 %v564_v54 }
 0x1fe   : > { %v1200_v56 = vpop.eup %1199 }
 0x1ff   : > { %v740_v58 = vsub.f32 1.0, %v1200_v56 }
 0x201   : > { %v741_v60 = vmul.f32 0.5, %v740_v58 }
 0x225   : > { %v576_v62 = vpop.xlane.xlu1 %575 }
 0x226   : > { %1201 = vrcp.f32 %v576_v62 }
 0x230   : > { %v1202_v63 = vpop.eup %1201 }
 0x231   : > { %v1548_v0 = vmul.f32 %v1202_v63, %v1196_v44 }
 0x233   : > { %v582_v2 = vsel %vm567_vm3, %v1548_v0, -inf }
 0x266   : > { %v703_v55 = vpop.f32.mrb[2].mxu1 }
 0x267   : > { %714 = vperm.xlu0 %1184, %v703_v55   ;;  %v1074_v57 = vpop.f32.mrb[3].mxu1  ;;  %709 = vperm.xlu1 %1183, %v703_v55  }
 0x26b   : > { %1187 = vset.pattern.permute.xlu0 %v1275_v8  ;;  %1185 = vset.pattern.permute.xlu1 %v1276_v59 }
 0x26c   : > { %736 = vperm.xlu0 %1187, %v1200_v56   ;;  %720 = vperm.xlu1 %1185, %v703_v55  }
 0x270   : > { %744 = vperm.xlu0 %1187, %v741_v60   ;;  %1186 = vset.pattern.permute.xlu1 %v1277_v61 }
 0x271   : > { %726 = vperm.xlu1 %1186, %v703_v55  }
 0x275   : > { %1188 = vset.pattern.permute.xlu1 %v1274_v46 }
 0x295   : > { %583 = vmax.xlane.f32.xlu1 %v582_v2 }
 0x2e6   : > { %v710_v3 = vpop.permute.xlu1 %709  ;;  %v715_v5 = vpop.permute.xlu0 %714 }
 0x2e7   : > { %v712_v7 = vsel %vm611_vm8, %v710_v3, 0.0  ;;  %v717_v9 = vsel %vm1557_vm9, %v715_v5, 0.0 }
 0x2e8   : > { %v718_v13 = vadd.f32 %v717_v9, %v712_v7 }
 0x2eb   : > { %v721_v10 = vpop.permute.xlu1 %720  ;;  %v737_v19 = vpop.permute.xlu0 %736 }
 0x2ec   : > { %v723_v11 = vsel %vm1561_vm10, %v721_v10, 0.0 }
 0x2ed   : > { %v724_v14 = vadd.f32 %v723_v11, %v718_v13 }
 0x2ef   : > { %v745_v23 = vpop.permute.xlu0 %744 }
 0x2f0   : > { %v727_v15 = vpop.permute.xlu1 %726 }
 0x2f1   : > { %v729_v16 = vsel %vm1574_vm12, %v727_v15, 0.0 }
 0x2f2   : > { %v730_v17 = vadd.f32 %v729_v16, %v724_v14 }
 0x2f4   : > { %v731_v18 = vadd.f32 1e-30, %v730_v17 }
 0x2f6   : > { %1203 = vrcp.f32 %v731_v18 }
 0x300   : > { %v1204_v20 = vpop.eup %1203 }
 0x301   : > { %v733_v21 = vmul.f32 %v1204_v20, %v1542_v43 }
 0x303   : > { %v739_v22 = vmul.f32 %v737_v19, %v733_v21 }
 0x305   : > { %v1581_v24 = vadd.f32 %v745_v23, %v739_v22 }
 0x307   : > { %v771_v25 = vsel %vm1557_vm9, %v1581_v24, -1e+30  ;;  %v748_v26 = vsel %vm611_vm8, %v1581_v24, -1e+30  ;;  %v795_v27 = vsel %vm1561_vm10, %v1581_v24, -1e+30 }
 0x308   : > { %772 = vmax.xlane.f32.xlu1 %v771_v25  ;;  %749 = vmax.xlane.f32.xlu0 %v748_v26  ;;  %v819_v28 = vsel %vm1574_vm12, %v1581_v24, -1e+30 }
 0x30c   : > { %796 = vmax.xlane.f32.xlu1 %v795_v27 }
 0x310   : > { %820 = vmax.xlane.f32.xlu1 %v819_v28 }
 0x322   : > { %v584_v30 = vpop.xlane.xlu1 %583 }
 0x323   : > { %vm585_vm13 = vcmp.eq.f32.partialorder %v1548_v0, %v584_v30 }
 0x324   : > { %v586_v31 = vsel %vm585_vm13, %v1596_v29, 4.0 }
 0x325   : > { %v587_v32 = vsel %vm567_vm3, %v586_v31, inf }
 0x326   : > { %588 = vmin.xlane.f32.xlu1 %v587_v32 }
 0x395   : > { %v773_v33 = vpop.xlane.xlu1 %772  ;;  %v750_v34 = vpop.xlane.xlu0 %749 }
 0x396   : > { %vm751_vm14 = vcmp.eq.f32.partialorder %v748_v26, %v750_v34  ;;  %vm774_vm15 = vcmp.eq.f32.partialorder %v771_v25, %v773_v33 }
 0x397   : > { %v752_v35 = vsel %vm751_vm14, %v1596_v29, 128.0  ;;  %v775_v37 = vsel %vm774_vm15, %v1596_v29, 128.0 }
 0x398   : > { %753 = vmin.xlane.f32.xlu1 %v752_v35 }
 0x399   : > { %v797_v36 = vpop.xlane.xlu1 %796 }
 0x39a   : > { %vm798_vm0 = vcmp.eq.f32.partialorder %v795_v27, %v797_v36 }
 0x39b   : > { %v799_v39 = vsel %vm798_vm0, %v1596_v29, 128.0 }
 0x39c   : > { %776 = vmin.xlane.f32.xlu1 %v775_v37 }
 0x39d   : > { %v821_v38 = vpop.xlane.xlu1 %820 }
 0x39e   : > { %vm822_vm1 = vcmp.eq.f32.partialorder %v819_v28, %v821_v38 }
 0x39f   : > { %v823_v40 = vsel %vm822_vm1, %v1596_v29, 128.0 }
 0x3a0   : > { %800 = vmin.xlane.f32.xlu1 %v799_v39 }
 0x3a4   : > { %824 = vmin.xlane.f32.xlu1 %v823_v40 }
 0x3b3   : > { %v589_v41 = vpop.xlane.xlu1 %588 }
 0x3b4   : > { %vm590_vm2 = vcmp.eq.f32.partialorder %v1596_v29, %v589_v41 }
 0x3b5   : > { %v591_v42 = vsel %vm590_vm2, -1e+30, %v1548_v0 }
 0x3b6   : > { %v592_v43 = vsel %vm567_vm3, %v591_v42, -inf }
 0x3b7   : > { %593 = vmax.xlane.f32.xlu0 %v592_v43 }
 0x425   : > { %v754_v44 = vpop.xlane.xlu1 %753 }
 0x426   : > { %vm755_vm7 = vcmp.eq.f32.partialorder %v1596_v29, %v754_v44 }
 0x427   : > { %v756_v52 = vsel %vm755_vm7, -1e+30, %v748_v26 }
 0x429   : > { %v777_v45 = vpop.xlane.xlu1 %776 }
 0x42a   : > { %vm778_vm4 = vcmp.eq.f32.partialorder %v1596_v29, %v777_v45 }
 0x42b   : > { %v779_v46 = vsel %vm778_vm4, -1e+30, %v771_v25 }
 0x42c   : > { %780 = vmax.xlane.f32.xlu0 %v779_v46 }
 0x42d   : > { %v801_v8 = vpop.xlane.xlu1 %800 }
 0x42e   : > { %vm802_vm11 = vcmp.eq.f32.partialorder %v1596_v29, %v801_v8 }
 0x42f   : > { %v803_v53 = vsel %vm802_vm11, -1e+30, %v795_v27 }
 0x431   : > { %v825_v47 = vpop.xlane.xlu1 %824 }
 0x432   : > { %vm826_vm5 = vcmp.eq.f32.partialorder %v1596_v29, %v825_v47 }
 0x433   : > { %v827_v48 = vsel %vm826_vm5, -1e+30, %v819_v28 }
 0x434   : > { %828 = vmax.xlane.f32.xlu0 %v827_v48 }
 0x444   : > { %v594_v49 = vpop.xlane.xlu0 %593 }
 0x445   : > { %vm595_vm6 = vcmp.eq.f32.partialorder %v591_v42, %v594_v49 }
 0x446   : > { %v596_v50 = vsel %vm595_vm6, %v1596_v29, 4.0 }
 0x447   : > { %v597_v51 = vsel %vm567_vm3, %v596_v50, inf }
 0x448   : > { %598 = vmin.xlane.f32.xlu1 %v597_v51 }
 0x44c   : > { %757 = vmax.xlane.f32.xlu1 %v756_v52 }
 0x450   : > { %804 = vmax.xlane.f32.xlu1 %v803_v53 }
 0x4b9   : > { %v781_v58 = vpop.xlane.xlu0 %780 }
 0x4ba   : > { %vm782_vm0 = vcmp.eq.f32.partialorder %v779_v46, %v781_v58 }
 0x4c1   : > { %v829_v62 = vpop.xlane.xlu0 %828 }
 0x4c2   : > { %vm830_vm1 = vcmp.eq.f32.partialorder %v827_v48, %v829_v62 }
 0x4d5   : > { %v599_v54 = vpop.xlane.xlu1 %598 }
 0x4d6   : > { %vm600_vm13 = vcmp.eq.f32.partialorder %v1596_v29, %v599_v54 }
 0x4d7   : > { %vm601_vm14 = vmor %vm590_vm2, %vm600_vm13 }
 0x4d8   : > { %v602_v55 = vsel %vm601_vm14, %v1548_v0, 0.0  ;;  %v783_v0 = vsel %vm782_vm0, %v1596_v29, 128.0 }
 0x4d9   : > { %790 = vperm.xlu1 %1188, %v602_v55   ;;  %767 = vperm.xlu0 %1187, %v602_v55   ;;  %v758_v56 = vpop.xlane.xlu1 %757 }
 0x4da   : > { %vm759_vm3 = vcmp.eq.f32.partialorder %v756_v52, %v758_v56 }
 0x4db   : > { %v760_v60 = vsel %vm759_vm3, %v1596_v29, 128.0 }
 0x4dd   : > { %1189 = vset.pattern.permute.xlu1 %v1276_v59  ;;  %1190 = vset.pattern.permute.xlu0 %v1277_v61  ;;  %v805_v57 = vpop.xlane.xlu1 %804  ;;  %v831_v59 = vsel %vm830_vm1, %v1596_v29, 128.0 }
 0x4de   : > { %vm806_vm15 = vcmp.eq.f32.partialorder %v803_v53, %v805_v57 }
 0x4df   : > { %v807_v63 = vsel %vm806_vm15, %v1596_v29, 128.0 }
 0x4f8   : > { %761 = vmin.xlane.f32.xlu0 %v760_v60 }
 0x4fc   : > { %808 = vmin.xlane.f32.xlu0 %v807_v63 }
 0x4fd   : > { %784 = vmin.xlane.f32.xlu1 %v783_v0 }
 0x501   : > { %832 = vmin.xlane.f32.xlu1 %v831_v59 }
 0x512   : > { %838 = vperm.xlu0 %1190, %v602_v55   ;;  %814 = vperm.xlu1 %1189, %v602_v55  }
 0x558   : > { %v768_v61 = vpop.permute.xlu0 %767  ;;  %v791_v2 = vpop.permute.xlu1 %790 }
 0x559   : > { %v793_v10 = vsel %vm1557_vm9, %v791_v2, 0.0  ;;  %v770_v11 = vsel %vm611_vm8, %v768_v61, 0.0 }
 0x55a   : > { %v794_v13 = vadd.f32 %v793_v10, %v770_v11 }
 0x585   : > { %v762_v3 = vpop.xlane.xlu0 %761 }
 0x586   : > { %vm763_vm6 = vcmp.eq.f32.partialorder %v1596_v29, %v762_v3 }
 0x587   : > { %vm764_vm14 = vmor %vm755_vm7, %vm763_vm6 }
 0x589   : > { %v809_v7 = vpop.xlane.xlu0 %808 }
 0x58a   : > { %v785_v5 = vpop.xlane.xlu1 %784  ;;  %vm810_vm3 = vcmp.eq.f32.partialorder %v1596_v29, %v809_v7 }
 0x58b   : > { %vm786_vm2 = vcmp.eq.f32.partialorder %v1596_v29, %v785_v5 }
 0x58c   : > { %vm787_vm13 = vmor %vm778_vm4, %vm786_vm2 }
 0x58d   : > { %vm788_vm0 = vmor %vm764_vm14, %vm787_vm13 }
 0x58e   : > { %v833_v9 = vpop.xlane.xlu1 %832  ;;  %vm811_vm4 = vmor %vm802_vm11, %vm810_vm3 }
 0x58f   : > { %vm834_vm15 = vcmp.eq.f32.partialorder %v1596_v29, %v833_v9  ;;  %vm812_vm9 = vmor %vm788_vm0, %vm811_vm4 }
 0x590   : > { %vm835_vm1 = vmor %vm826_vm5, %vm834_vm15 }
 0x591   : > { %v839_v4 = vpop.permute.xlu0 %838  ;;  %vm836_vm8 = vmor %vm812_vm9, %vm835_vm1 }
 0x592   : > { %v815_v14 = vpop.permute.xlu1 %814  ;;  %v841_v16 = vsel %vm1574_vm12, %v839_v4, 0.0  ;;  %v843_v18 = vsel %vm836_vm8, %v1581_v24, 0.0 }
 0x593   : > { %v817_v1 = vsel %vm1561_vm10, %v815_v14, 0.0 }
 0x594   : > { %v818_v15 = vadd.f32 %v817_v1, %v794_v13 }
 0x596   : > { %v842_v17 = vadd.f32 %v841_v16, %v818_v15 }
 0x598   : > { %v844_v19 = vmul.f32 %v843_v18, %v842_v17 }
 0x59a   : > { %845 = vadd.xlane.f32.xlu1 %v844_v19 }
 0x627   : > { %v846_v20 = vpop.xlane.xlu1 %845 }
 0x628   : > { %v847_v21 = vadd.f32 1e-09, %v846_v20 }
 0x62a   : > { %1205 = vrcp.f32 %v847_v21 }
 0x634   : > { %v1206_v22 = vpop.eup %1205 }
 0x635   : > { %v849_v23 = vmul.f32 %v1206_v22, %v844_v19 }
 0x637   : > { %850 = vmax.xlane.f32.xlu0 %v849_v23 }
 0x6c4   : > { %v851_v6 = vpop.xlane.xlu0 %850 }
 0x6c5   : > { %vm852_vm10 = vcmp.eq.f32.partialorder %v849_v23, %v851_v6 }
 0x6c6   : > { %v853_v25 = vsel %vm852_vm10, %v1596_v29, 128.0 }
 0x6c7   : > { %854 = vmin.xlane.f32.xlu1 %v853_v25 }
 0x754   : > { %v855_v12 = vpop.xlane.xlu1 %854 }
 0x755   : > { %vm856_vm12 = vcmp.eq.f32.partialorder %v1596_v29, %v855_v12 }
 0x756   : > { %v857_v26 = vsel %vm856_vm12, -1e+30, %v849_v23 }
 0x757   : > { %858 = vmax.xlane.f32.xlu0 %v857_v26 }
 0x7e4   : > { %v859_v24 = vpop.xlane.xlu0 %858 }
 0x7e5   : > { %vm860_vm5 = vcmp.eq.f32.partialorder %v857_v26, %v859_v24 }
 0x7e6   : > { %v861_v27 = vsel %vm860_vm5, %v1596_v29, 128.0 }
 0x7e7   : > { %862 = vmin.xlane.f32.xlu1 %v861_v27 }
 0x874   : > { %v863_v28 = vpop.xlane.xlu1 %862 }
 0x875   : > { %vm864_vm7 = vcmp.eq.f32.partialorder %v1596_v29, %v863_v28 }
 0x876   : > { %vm865_vm11 = vmor %vm856_vm12, %vm864_vm7 }
 0x877   : > { %v866_v30 = vsel %vm865_vm11, %v849_v23, 0.0 }
 0x878   : > { %867 = vst [vmem:[%s271_s24] sm:$0xff] %v866_v30 }
 0x879   : > { %1220 = shalt.err (!%p1217_p3)
}
 0x87a   : > { %s1221_s18 = scalar_lea.hbm %s1664_s10, 128  ;;  %s1225_s21 = scalar_lea.hbm %s1713_s7, 256 }
 0x87b   : > { %p1222_p4 = scmp.ne.s32.totalorder %s1664_s10, %s1221_s18  ;;  %p1226_p9 = scmp.lt.u32.totalorder %s1664_s10, %s1713_s7 }
 0x87c   : > { %p1227_p10 = scmp.lt.u32.totalorder %s1225_s21, %s1221_s18  ;;  %p1229_p12 = scmp.lt.u32.totalorder %s1221_s18, %s1664_s10 }
 0x87d   : > { %p1223_p7 = pnand %p1222_p4, %p1360_p5 }
 0x87e   : > { %p1228_p11 = por %p1227_p10, %p1226_p9 }
 0x87f   : > { %p1224_p8 = pneg %p1223_p7 }
 0x880   : > { %p1230_p13 = por %p1229_p12, %p1228_p11 }
 0x882   : > { %p1231_p0 = pnand %p1230_p13, %p1224_p8 }
 0x884   : > { %1234 = shalt.err (!%p1231_p0)
}
 0x885   : > { %1137 = dma.vmem_to_hbm [thread:$0]  (%p1360_p5), %s1666_s25, 128, %s1664_s10, %s869_s14  }
 0x886 PF: > { %p1143_p1 = scmp.ge.s32.totalorder %s1269_s29, 2  ;;  %s894_s24 = sand.u32 1, %s1257_s26  }
 0x887   : > { %s895_s30 = scalar_lea.sflag [#allocation4], %s894_s24 }
 0x888   : > { %p1140_p2 = pnand %p1143_p1, %p1364_p6 }
 0x88a   : > { %1252 = dma.done.wait (!%p1140_p2), %s895_s30, 128  }
 0x88b   : > { %1254 = vsyncadd (!%p1140_p2), %s895_s30, 4294967168  ;;  %p19_p3 = scmp.ge.s32.totalorder %s1347_s8, 4   ;;  %s1722_s26 = smov %s1261_s27 }
 0x88c   : > { %s1723_s27 = smov %s1265_s28  ;;  %s1724_s28 = smov %s1358_s11 }
 0x88d   : > { %s1725_s29 = smov %s1347_s8  ;;  %21 = sbr.rel (!%p19_p3) target bundleno = 6 (0x6), region = 83 }
 0x894   :  { %900 = vsyncpa [#allocation4], 1 }
 0x895   :  { %902 = vsyncpa [#allocation4 + $0x1], 1 }

</bundles_post_ra>
